<compile_context>
chip_gen: v5e
topology: v5e:2x2
jax: 0.10.0
libtpu: 0.0.40
codegen_flags: <defaults>
</compile_context>

<pallas_src>
import math

import numpy as np
import jax
import jax.numpy as jnp
from jax import lax
from jax.experimental import pallas as pl
from jax.experimental.pallas import tpu as pltpu


def _round_up(x, m):
    return (x + m - 1) // m * m


def _device_kind():
    try:
        return jax.devices()[0].device_kind.lower()
    except Exception:
        return ""


def _default_b_tile():
    kind = _device_kind()
    if ("v6" in kind) or ("v7" in kind):
        return 256
    return 128


def _vmem_cap_bytes():
    kind = _device_kind()
    if "v7" in kind:
        return 56 << 20      # 64 MiB / TC physical on v7x; leave compiler headroom
    return 100 << 20         # v5e / v6e: 128 MiB physical


def _pack_gate_matrix(w, hp):
    """(3H, K) torch [r|z|n]-stacked rows -> (K, 3*hp), each gate zero-padded."""
    three_h, k = w.shape
    h = three_h // 3
    w = w.reshape(3, h, k)
    w = jnp.pad(w, ((0, 0), (0, hp - h), (0, 0)))
    return jnp.transpose(w, (2, 0, 1)).reshape(k, 3 * hp)


def _pack_gate_vector(b, hp):
    """(3H,) torch [r|z|n] -> (3*hp,), each gate zero-padded to hp."""
    h = b.shape[0] // 3
    return jnp.pad(b.reshape(3, h), ((0, 0), (0, hp - h))).reshape(3 * hp)


def _gru_bidir_kernel(nsteps_ref,                # SMEM (num_tiles,) int32
                      xf_ref, xr_ref,            # (Tc, Bt, D)   matmul dtype
                      lens_ref,                  # (Bt, 1)       int32
                      wih_f_ref, wih_r_ref,      # (D, 3*Hp)     matmul dtype
                      whh_f_ref, whh_r_ref,      # (Hp, 3*Hp)    matmul dtype
                      bx_ref,                    # (2, 3*Hp) f32 (bih + bhh_{r,z})
                      bhn_ref,                   # (2, Hp)   f32 (bhh_n  fwd|bwd)
                      out_f_ref, out_r_ref,      # (Tc, Bt, Hp)  out dtype
                      gxf_sc, gxr_sc,            # VMEM (Tc, Bt, 3*Hp) matmul dtype
                      hf_sc, hb_sc):             # VMEM (Bt, Hp) f32 (chunk carry)
    Tc, Bt, D = xf_ref.shape
    Hp = whh_f_ref.shape[0]
    mm_dtype = whh_f_ref.dtype

    b = pl.program_id(0)
    c = pl.program_id(1)
    nchunks = pl.num_programs(1)

    nsteps = nsteps_ref[b]                       # max valid length in this tile
    lens = lens_ref[...]                         # (Bt, 1) int32

    t0_f = c * Tc                                # global start of forward chunk
    t0_r = (nchunks - 1 - c) * Tc                # global start of backward chunk
    nvalid_f = jnp.clip(nsteps - t0_f, 0, Tc)    # valid steps in the fwd chunk
    nvalid_r = jnp.clip(nsteps - t0_r, 0, Tc)    # valid steps in the bwd chunk

    # ---- carried hidden state: reset at the first time chunk of each tile ----
    @pl.when(c == 0)
    def _():
        hf_sc[...] = jnp.zeros_like(hf_sc)
        hb_sc[...] = jnp.zeros_like(hb_sc)

    bhn_f = bhn_ref[0:1, :]                      # (1, Hp)
    bhn_r = bhn_ref[1:2, :]

    def gru_step(gx_t, h_prev, whh_ref, bhn_d):
        # Gates laid out [r | z | n] in lane-aligned Hp-wide slabs.
        gh = jnp.dot(h_prev.astype(mm_dtype), whh_ref[...],
                     preferred_element_type=jnp.float32)
        gx_t = gx_t.astype(jnp.float32)
        r = jax.nn.sigmoid(gx_t[:, :Hp] + gh[:, :Hp])
        z = jax.nn.sigmoid(gx_t[:, Hp:2 * Hp] + gh[:, Hp:2 * Hp])
        n = jnp.tanh(gx_t[:, 2 * Hp:] + r * (gh[:, 2 * Hp:] + bhn_d))
        return (1.0 - z) * n + z * h_prev

    # ---- forward chunk prologue: input GEMM straight into scratch, or a
    # whole-chunk zero store when the chunk is entirely past every length ------
    @pl.when(nvalid_f == 0)
    def _():
        out_f_ref[...] = jnp.zeros_like(out_f_ref)

    @pl.when(nvalid_f > 0)
    def _():
        gx = jnp.dot(xf_ref[...].reshape(Tc * Bt, D), wih_f_ref[...],
                     preferred_element_type=jnp.float32) + bx_ref[0:1, :]
        gxf_sc[...] = gx.reshape(Tc, Bt, 3 * Hp).astype(gxf_sc.dtype)

        def zero_tail(t, carry):                 # tail-only zero fill
            out_f_ref[t] = jnp.zeros((Bt, Hp), out_f_ref.dtype)
            return carry
        lax.fori_loop(nvalid_f, Tc, zero_tail, 0)

    # ---- backward chunk prologue ---------------------------------------------
    @pl.when(nvalid_r == 0)
    def _():
        out_r_ref[...] = jnp.zeros_like(out_r_ref)

    @pl.when(nvalid_r > 0)
    def _():
        gx = jnp.dot(xr_ref[...].reshape(Tc * Bt, D), wih_r_ref[...],
                     preferred_element_type=jnp.float32) + bx_ref[1:2, :]
        gxr_sc[...] = gx.reshape(Tc, Bt, 3 * Hp).astype(gxr_sc.dtype)

        def zero_tail(t, carry):
            out_r_ref[t] = jnp.zeros((Bt, Hp), out_r_ref.dtype)
            return carry
        lax.fori_loop(nvalid_r, Tc, zero_tail, 0)

    # ---- recurrences: fwd + bwd fused over the common prefix (2 chains) -------
    def fwd_step(t, h):
        h_new = gru_step(gxf_sc[t], h, whh_f_ref, bhn_f)
        m = (t0_f + t) < lens                    # (Bt, 1) bool
        out_f_ref[t] = jnp.where(m, h_new, 0.0).astype(out_f_ref.dtype)
        return jnp.where(m, h_new, h)

    def bwd_step(i, h):
        t = nvalid_r - 1 - i                     # local time, decreasing
        h_new = gru_step(gxr_sc[t], h, whh_r_ref, bhn_r)
        m = (t0_r + t) < lens
        out_r_ref[t] = jnp.where(m, h_new, 0.0).astype(out_r_ref.dtype)
        return jnp.where(m, h_new, h)

    def both_step(i, carry):
        hf, hb = carry
        return fwd_step(i, hf), bwd_step(i, hb)

    ncommon = jnp.minimum(nvalid_f, nvalid_r)
    hf, hb = lax.fori_loop(0, ncommon, both_step, (hf_sc[...], hb_sc[...]))
    hf = lax.fori_loop(ncommon, nvalid_f, fwd_step, hf)
    hb = lax.fori_loop(ncommon, nvalid_r, bwd_step, hb)
    hf_sc[...] = hf
    hb_sc[...] = hb


def make_gru_params(key, d_in, d_out):
    """PyTorch nn.GRU default init: U(-1/sqrt(H), 1/sqrt(H)), torch shapes."""
    H = d_out
    bound = 1.0 / math.sqrt(H)
    names = ["wih_f", "whh_f", "bih_f", "bhh_f",
             "wih_r", "whh_r", "bih_r", "bhh_r"]
    shapes = [(3 * H, d_in), (3 * H, H), (3 * H,), (3 * H,),
              (3 * H, d_in), (3 * H, H), (3 * H,), (3 * H,)]
    keys = jax.random.split(key, len(names))
    return {n: jax.random.uniform(k, s, jnp.float32, -bound, bound)
            for n, s, k in zip(names, shapes, keys)}


def rnn_forward(x, x_len, params, n_to_1=False,
                matmul_dtype=jnp.bfloat16, b_tile=None, t_chunk=64):
    """x: (B, T, D) float32 batch_first; x_len: (B,) int.  Returns (B, T, 2H)
    float32, or (B, 2H) if n_to_1.  Matmul operands run in `matmul_dtype`
    (bf16 by default); state and gate math are float32."""
    B, T, D = x.shape
    H = params["whh_f"].shape[1]
    Hp = _round_up(H, 128)                        # lane-aligned per-gate width

    mm_dtype = np.dtype(matmul_dtype)
    out_dtype = jnp.float32 if mm_dtype == np.dtype(np.float32) else jnp.bfloat16
    itemsize = mm_dtype.itemsize
    sublane = {4: 8, 2: 16, 1: 32}[itemsize]

    # ---- batch tile: fill MXU rows, never exceed the actual batch ------------
    if b_tile is None:
        b_tile = _default_b_tile()
    B_TILE = _round_up(max(min(b_tile, B), 1), sublane)
    B_pad = _round_up(B, B_TILE)
    num_tiles = B_pad // B_TILE
    if ("v7" in _device_kind()) and num_tiles == 1:
        # Keep the "parallel" batch axis shardable across v7x's two TensorCores.
        half = _round_up((B + 1) // 2, sublane)
        if half < B_TILE:
            B_TILE = half
            B_pad = _round_up(B, B_TILE)
            num_tiles = B_pad // B_TILE

    # ---- time chunking: bounds VMEM residency independently of T -------------
    Tc = max(1, min(t_chunk, T))
    T_pad = _round_up(T, Tc)
    num_chunks = T_pad // Tc

    # ---- weights/biases: torch layout -> lane-aligned [r|z|n] slabs ----------
    wih_f_p = _pack_gate_matrix(params["wih_f"], Hp).astype(mm_dtype)   # (D, 3Hp)
    wih_r_p = _pack_gate_matrix(params["wih_r"], Hp).astype(mm_dtype)

    def pack_whh(w):
        w = _pack_gate_matrix(w, Hp)                                    # (H, 3Hp)
        return jnp.pad(w, ((0, Hp - H), (0, 0))).astype(mm_dtype)       # (Hp, 3Hp)

    whh_f_p = pack_whh(params["whh_f"])
    whh_r_p = pack_whh(params["whh_r"])

    bih_f_p = _pack_gate_vector(params["bih_f"], Hp)
    bih_r_p = _pack_gate_vector(params["bih_r"], Hp)
    bhh_f_p = _pack_gate_vector(params["bhh_f"], Hp)
    bhh_r_p = _pack_gate_vector(params["bhh_r"], Hp)
    # bih + bhh pre-summed for the r/z gates (bhh_n must stay inside r * (.)).
    bx = jnp.stack([bih_f_p + bhh_f_p.at[2 * Hp:].set(0.0),
                    bih_r_p + bhh_r_p.at[2 * Hp:].set(0.0)]).astype(jnp.float32)
    bhn = jnp.stack([bhh_f_p[2 * Hp:], bhh_r_p[2 * Hp:]]).astype(jnp.float32)

    # ---- sort by descending length so per-tile trip counts are tight ---------
    x_len_i = x_len.astype(jnp.int32)
    order = jnp.argsort(-x_len_i)
    inv_order = jnp.argsort(order)
    x_s = jnp.take(x, order, axis=0)
    len_s = jnp.take(x_len_i, order, axis=0)

    # ---- inputs: time-major, padded in batch and time ------------------------
    x_tm = jnp.transpose(x_s, (1, 0, 2)).astype(mm_dtype)               # (T, B, D)
    x_tm = jnp.pad(x_tm, ((0, T_pad - T), (0, B_pad - B), (0, 0)))
    lens_flat = jnp.pad(len_s, (0, B_pad - B))
    lens = lens_flat.reshape(B_pad, 1)
    nsteps = lens_flat.reshape(num_tiles, B_TILE).max(axis=1)           # per tile

    # ---- VMEM budget (resident set + headroom), clamped per chip generation --
    out_isize = np.dtype(out_dtype).itemsize
    resident = (
        2 * 2 * Tc * B_TILE * D * itemsize            # xf + xr, double-buffered
        + 2 * 2 * Tc * B_TILE * Hp * out_isize        # out_f + out_r, double-buf
        + 2 * 2 * (D + Hp) * 3 * Hp * itemsize        # wih / whh, both directions
        + 2 * Tc * B_TILE * 3 * Hp * itemsize         # gx scratches
        + Tc * B_TILE * 3 * Hp * 4                    # f32 GEMM temporary
        + 2 * B_TILE * Hp * 4                         # carried states
        + 8 * Hp * 4)                                 # biases
    vmem_limit = int(min(max(int(1.4 * resident) + (8 << 20), 32 << 20),
                         _vmem_cap_bytes()))

    grid_spec = pltpu.PrefetchScalarGridSpec(
        num_scalar_prefetch=1,
        grid=(num_tiles, num_chunks),
        in_specs=[
            pl.BlockSpec((Tc, B_TILE, D), lambda b, c, ns: (c, b, 0)),
            pl.BlockSpec((Tc, B_TILE, D),
                         lambda b, c, ns: (num_chunks - 1 - c, b, 0)),
            pl.BlockSpec((B_TILE, 1), lambda b, c, ns: (b, 0)),
            pl.BlockSpec((D, 3 * Hp), lambda b, c, ns: (0, 0)),
            pl.BlockSpec((D, 3 * Hp), lambda b, c, ns: (0, 0)),
            pl.BlockSpec((Hp, 3 * Hp), lambda b, c, ns: (0, 0)),
            pl.BlockSpec((Hp, 3 * Hp), lambda b, c, ns: (0, 0)),
            pl.BlockSpec((2, 3 * Hp), lambda b, c, ns: (0, 0)),
            pl.BlockSpec((2, Hp), lambda b, c, ns: (0, 0)),
        ],
        out_specs=[
            pl.BlockSpec((Tc, B_TILE, Hp), lambda b, c, ns: (c, b, 0)),
            pl.BlockSpec((Tc, B_TILE, Hp),
                         lambda b, c, ns: (num_chunks - 1 - c, b, 0)),
        ],
        scratch_shapes=[
            pltpu.VMEM((Tc, B_TILE, 3 * Hp), mm_dtype),
            pltpu.VMEM((Tc, B_TILE, 3 * Hp), mm_dtype),
            pltpu.VMEM((B_TILE, Hp), jnp.float32),
            pltpu.VMEM((B_TILE, Hp), jnp.float32),
        ],
    )

    out_f, out_r = pl.pallas_call(
        _gru_bidir_kernel,
        out_shape=(jax.ShapeDtypeStruct((T_pad, B_pad, Hp), out_dtype),
                   jax.ShapeDtypeStruct((T_pad, B_pad, Hp), out_dtype)),
        grid_spec=grid_spec,
        compiler_params=pltpu.CompilerParams(
            dimension_semantics=("parallel", "arbitrary"),
            vmem_limit_bytes=vmem_limit),
    )(nsteps, x_tm, x_tm, lens, wih_f_p, wih_r_p, whh_f_p, whh_r_p, bx, bhn)

    # Direction concat / un-pad / un-sort / transpose back to batch_first: XLA.
    out = jnp.concatenate([out_f[:T, :B, :H], out_r[:T, :B, :H]], axis=-1)
    out = jnp.transpose(out, (1, 0, 2)).astype(jnp.float32)             # (B,T,2H)
    out = jnp.take(out, inv_order, axis=0)
    if n_to_1:
        idx = jnp.maximum(x_len_i - 1, 0).reshape(B, 1, 1)
        return jnp.take_along_axis(
            out, jnp.broadcast_to(idx, (B, 1, 2 * H)), axis=1)[:, 0, :]
    return out


# ---------------- pure-JAX reference (for verification) ----------------------
def _ref_gru_bidir(x, x_len, p):
    B, T, D = x.shape
    H = p["whh_f"].shape[1]
    P = jax.lax.Precision.HIGHEST

    def cell(x_t, h, wih, whh, bih, bhh):
        gx = jnp.dot(x_t, wih.T, precision=P) + bih
        gh = jnp.dot(h, whh.T, precision=P) + bhh
        r = jax.nn.sigmoid(gx[:, :H] + gh[:, :H])
        z = jax.nn.sigmoid(gx[:, H:2 * H] + gh[:, H:2 * H])
        n = jnp.tanh(gx[:, 2 * H:] + r * gh[:, 2 * H:])
        return (1 - z) * n + z * h

    def run(direction):
        suf = "_f" if direction == "fwd" else "_r"
        order = range(T) if direction == "fwd" else range(T - 1, -1, -1)
        h = jnp.zeros((B, H), jnp.float32)
        outs = [None] * T
        for t in order:
            h_new = cell(x[:, t, :], h, p["wih" + suf], p["whh" + suf],
                         p["bih" + suf], p["bhh" + suf])
            m = (t < x_len).astype(jnp.float32)[:, None]
            h = m * h_new + (1 - m) * h
            outs[t] = m * h_new
        return jnp.stack(outs, axis=1)

    return jnp.concatenate([run("fwd"), run("bwd")], axis=-1)


if __name__ == "__main__":
    # Small shapes consistent with the module: B=2, T=8, d_in=16, model_dim=32.
    B, T, D_IN, D_OUT = 2, 8, 16, 32

    key = jax.random.PRNGKey(0)
    kx, kp, kx2, kl2 = jax.random.split(key, 4)
    x = jax.random.normal(kx, (B, T, D_IN), jnp.float32)
    x_len = jnp.array([5, 8], dtype=jnp.int32)        # unsorted: exercises sort
    params = make_gru_params(kp, D_IN, D_OUT)

    ref = _ref_gru_bidir(x, x_len, params)

    # f32-operand path.  Tolerance allows for TPU MXU multi-pass f32 matmuls.
    out_f32 = jax.block_until_ready(
        rnn_forward(x, x_len, params, matmul_dtype=jnp.float32))
    assert out_f32.shape == (B, T, 2 * D_OUT)
    np.testing.assert_allclose(np.asarray(out_f32), np.asarray(ref),
                               rtol=1e-3, atol=1e-2)

    # Multi-tile / multi-time-chunk configuration: exercises the chunked,
    # double-buffered pipeline, state carry across chunks, padded tail tiles
    # and the length sort / unsort.
    B2, T2 = 20, 12
    x2 = jax.random.normal(kx2, (B2, T2, D_IN), jnp.float32)
    len2 = jax.random.randint(kl2, (B2,), 1, T2 + 1, dtype=jnp.int32)
    ref2 = _ref_gru_bidir(x2, len2, params)
    out2 = jax.block_until_ready(
        rnn_forward(x2, len2, params, matmul_dtype=jnp.float32,
                    b_tile=8, t_chunk=4))
    assert out2.shape == (B2, T2, 2 * D_OUT)
    np.testing.assert_allclose(np.asarray(out2), np.asarray(ref2),
                               rtol=1e-3, atol=1e-2)

    # Perf path (bf16 MXU operands, bf16 gx scratch / outputs, f32 state).
    out_bf16 = jax.block_until_ready(
        rnn_forward(x, x_len, params, matmul_dtype=jnp.bfloat16))
    assert out_bf16.shape == (B, T, 2 * D_OUT)
    np.testing.assert_allclose(np.asarray(out_bf16), np.asarray(ref),
                               rtol=0.0, atol=6e-2)

    # n_to_1 (last valid timestep) path.
    last = jax.block_until_ready(
        rnn_forward(x, x_len, params, n_to_1=True, matmul_dtype=jnp.float32))
    ref_last = np.asarray(ref)[np.arange(B), np.asarray(x_len) - 1, :]
    np.testing.assert_allclose(np.asarray(last), ref_last,
                               rtol=1e-3, atol=1e-2)

    print("KERNEL_OK")
</pallas_src>

<mosaic_0001>
module attributes {stable_mosaic.version = 11 : i64} {
  func.func @_gru_bidir_kernel(%arg0: i32, %arg1: i32, %arg2: memref<1xi32, #tpu.memory_space<smem>>, %arg3: memref<8x8x16xf32, #tpu.memory_space<vmem>>, %arg4: memref<8x8x16xf32, #tpu.memory_space<vmem>>, %arg5: memref<8x1xi32, #tpu.memory_space<vmem>>, %arg6: memref<16x384xf32, #tpu.memory_space<vmem>>, %arg7: memref<16x384xf32, #tpu.memory_space<vmem>>, %arg8: memref<128x384xf32, #tpu.memory_space<vmem>>, %arg9: memref<128x384xf32, #tpu.memory_space<vmem>>, %arg10: memref<2x384xf32, #tpu.memory_space<vmem>>, %arg11: memref<2x128xf32, #tpu.memory_space<vmem>>, %arg12: memref<8x8x128xf32, #tpu.memory_space<vmem>>, %arg13: memref<8x8x128xf32, #tpu.memory_space<vmem>>, %arg14: memref<8x8x384xf32, #tpu.memory_space<vmem>>, %arg15: memref<8x8x384xf32, #tpu.memory_space<vmem>>, %arg16: memref<8x128xf32, #tpu.memory_space<vmem>>, %arg17: memref<8x128xf32, #tpu.memory_space<vmem>>) attributes {dimension_semantics = [#tpu.dimension_semantics<parallel>, #tpu.dimension_semantics<arbitrary>], iteration_bounds = array<i64: 1, 1>, scalar_prefetch = 1 : i64, scratch_operands = 4 : i64, tpu.core_type = #tpu.core_type<tc>, window_params = [{transform_indices = @transform_0, window_bounds = array<i64: 8, 8, 16>}, {transform_indices = @transform_1, window_bounds = array<i64: 8, 8, 16>}, {transform_indices = @transform_2, window_bounds = array<i64: 8, 1>}, {pipeline_mode = #tpu.pipeline_mode<synchronous>, transform_indices = @transform_3, window_bounds = array<i64: 16, 384>}, {pipeline_mode = #tpu.pipeline_mode<synchronous>, transform_indices = @transform_4, window_bounds = array<i64: 16, 384>}, {pipeline_mode = #tpu.pipeline_mode<synchronous>, transform_indices = @transform_5, window_bounds = array<i64: 128, 384>}, {pipeline_mode = #tpu.pipeline_mode<synchronous>, transform_indices = @transform_6, window_bounds = array<i64: 128, 384>}, {pipeline_mode = #tpu.pipeline_mode<synchronous>, transform_indices = @transform_7, window_bounds = array<i64: 2, 384>}, {pipeline_mode = #tpu.pipeline_mode<synchronous>, transform_indices = @transform_8, window_bounds = array<i64: 2, 128>}, {transform_indices = @transform_9, window_bounds = array<i64: 8, 8, 128>}, {transform_indices = @transform_10, window_bounds = array<i64: 8, 8, 128>}]} {
    %0 = arith.index_cast %arg0 : i32 to index
    %1 = memref.load %arg2[%0] : memref<1xi32, #tpu.memory_space<smem>>
    %c0 = arith.constant 0 : index
    %c0_0 = arith.constant 0 : index
    %2 = vector.load %arg5[%c0, %c0_0] : memref<8x1xi32, #tpu.memory_space<vmem>>, vector<8x1xi32>
    %c8_i32 = arith.constant 8 : i32
    %3 = arith.muli %arg1, %c8_i32 : i32
    %c0_i32 = arith.constant 0 : i32
    %4 = arith.subi %c0_i32, %arg1 : i32
    %c8_i32_1 = arith.constant 8 : i32
    %5 = arith.muli %4, %c8_i32_1 : i32
    %6 = arith.subi %1, %3 : i32
    %c0_i32_2 = arith.constant 0 : i32
    %c8_i32_3 = arith.constant 8 : i32
    %7 = arith.maxsi %c0_i32_2, %6 : i32
    %8 = arith.minsi %c8_i32_3, %7 : i32
    %9 = arith.subi %1, %5 : i32
    %c0_i32_4 = arith.constant 0 : i32
    %c8_i32_5 = arith.constant 8 : i32
    %10 = arith.maxsi %c0_i32_4, %9 : i32
    %11 = arith.minsi %c8_i32_5, %10 : i32
    %c0_i32_6 = arith.constant 0 : i32
    %12 = arith.cmpi eq, %arg1, %c0_i32_6 : i32
    %13 = arith.extui %12 : i1 to i32
    %c0_i32_7 = arith.constant 0 : i32
    %14 = arith.cmpi ne, %13, %c0_i32_7 : i32
    scf.if %14 {
      %cst = arith.constant 0.000000e+00 : f32
      %43 = vector.broadcast %cst : f32 to vector<8x128xf32>
      %c0_30 = arith.constant 0 : index
      %c0_31 = arith.constant 0 : index
      %44 = vector.load %arg16[%c0_30, %c0_31] : memref<8x128xf32, #tpu.memory_space<vmem>>, vector<8x128xf32>
      tpu.vector_store %arg16[%c0_30, %c0_31], %43 {strides = array<i32>} : memref<8x128xf32, #tpu.memory_space<vmem>>, vector<8x128xf32>,
      %cst_32 = arith.constant 0.000000e+00 : f32
      %45 = vector.broadcast %cst_32 : f32 to vector<8x128xf32>
      %c0_33 = arith.constant 0 : index
      %c0_34 = arith.constant 0 : index
      %46 = vector.load %arg17[%c0_33, %c0_34] : memref<8x128xf32, #tpu.memory_space<vmem>>, vector<8x128xf32>
      tpu.vector_store %arg17[%c0_33, %c0_34], %45 {strides = array<i32>} : memref<8x128xf32, #tpu.memory_space<vmem>>, vector<8x128xf32>,
    } else {
    }
    %c0_8 = arith.constant 0 : index
    %c0_9 = arith.constant 0 : index
    %15 = vector.load %arg11[%c0_8, %c0_9] : memref<2x128xf32, #tpu.memory_space<vmem>>, vector<1x128xf32>
    %c1 = arith.constant 1 : index
    %c0_10 = arith.constant 0 : index
    %16 = vector.load %arg11[%c1, %c0_10] : memref<2x128xf32, #tpu.memory_space<vmem>>, vector<1x128xf32>
    %c0_i32_11 = arith.constant 0 : i32
    %17 = arith.cmpi eq, %8, %c0_i32_11 : i32
    %18 = arith.extui %17 : i1 to i32
    %c0_i32_12 = arith.constant 0 : i32
    %19 = arith.cmpi ne, %18, %c0_i32_12 : i32
    scf.if %19 {
      %cst = arith.constant 0.000000e+00 : f32
      %43 = vector.broadcast %cst : f32 to vector<8x8x128xf32>
      %c0_30 = arith.constant 0 : index
      %c0_31 = arith.constant 0 : index
      %c0_32 = arith.constant 0 : index
      %44 = vector.load %arg12[%c0_30, %c0_31, %c0_32] : memref<8x8x128xf32, #tpu.memory_space<vmem>>, vector<8x8x128xf32>
      tpu.vector_store %arg12[%c0_30, %c0_31, %c0_32], %43 {strides = array<i32>} : memref<8x8x128xf32, #tpu.memory_space<vmem>>, vector<8x8x128xf32>,
    } else {
    }
    %c0_i32_13 = arith.constant 0 : i32
    %20 = arith.cmpi sgt, %8, %c0_i32_13 : i32
    %21 = arith.extui %20 : i1 to i32
    %c0_i32_14 = arith.constant 0 : i32
    %22 = arith.cmpi ne, %21, %c0_i32_14 : i32
    scf.if %22 {
      %c0_30 = arith.constant 0 : index
      %c0_31 = arith.constant 0 : index
      %c0_32 = arith.constant 0 : index
      %43 = vector.load %arg3[%c0_30, %c0_31, %c0_32] : memref<8x8x16xf32, #tpu.memory_space<vmem>>, vector<8x8x16xf32>
      %44 = vector.shape_cast %43 : vector<8x8x16xf32> to vector<64x16xf32>
      %c0_33 = arith.constant 0 : index
      %c0_34 = arith.constant 0 : index
      %45 = vector.load %arg6[%c0_33, %c0_34] : memref<16x384xf32, #tpu.memory_space<vmem>>, vector<16x384xf32>
      %cst = arith.constant dense<0.000000e+00> : vector<64x384xf32>
      %46 = tpu.matmul %44, %45, %cst {dimension_numbers = #tpu.dot_dimension_numbers<[1], [0], [0], [1], [0, 0, 1, 1], [], []>} : vector<64x16xf32>, vector<16x384xf32>, vector<64x384xf32> -> vector<64x384xf32>
      %c0_35 = arith.constant 0 : index
      %c0_36 = arith.constant 0 : index
      %47 = vector.load %arg10[%c0_35, %c0_36] : memref<2x384xf32, #tpu.memory_space<vmem>>, vector<1x384xf32>
      %48 = vector.broadcast %47 : vector<1x384xf32> to vector<64x384xf32>
      %49 = arith.addf %46, %48 : vector<64x384xf32>
      %50 = vector.shape_cast %49 : vector<64x384xf32> to vector<8x8x384xf32>
      %c0_37 = arith.constant 0 : index
      %c0_38 = arith.constant 0 : index
      %c0_39 = arith.constant 0 : index
      %51 = vector.load %arg14[%c0_37, %c0_38, %c0_39] : memref<8x8x384xf32, #tpu.memory_space<vmem>>, vector<8x8x384xf32>
      tpu.vector_store %arg14[%c0_37, %c0_38, %c0_39], %50 {strides = array<i32>} : memref<8x8x384xf32, #tpu.memory_space<vmem>>, vector<8x8x384xf32>,
      %c0_i32_40 = arith.constant 0 : i32
      %c8_i32_41 = arith.constant 8 : i32
      %52 = arith.subi %c8_i32_41, %8 : i32
      %53 = arith.addi %8, %52 : i32
      %c1_i32_42 = arith.constant 1 : i32
      scf.for %arg18 = %8 to %53 step %c1_i32_42  : i32 {
        %cst_43 = arith.constant 0.000000e+00 : f32
        %54 = vector.broadcast %cst_43 : f32 to vector<8x128xf32>
        %55 = arith.index_cast %arg18 : i32 to index
        %c0_44 = arith.constant 0 : index
        %c0_45 = arith.constant 0 : index
        %56 = vector.load %arg12[%55, %c0_44, %c0_45] : memref<8x8x128xf32, #tpu.memory_space<vmem>>, vector<1x8x128xf32>
        %57 = vector.shape_cast %56 : vector<1x8x128xf32> to vector<8x128xf32>
        %58 = vector.shape_cast %54 : vector<8x128xf32> to vector<1x8x128xf32>
        tpu.vector_store %arg12[%55, %c0_44, %c0_45], %58 {strides = array<i32>} : memref<8x8x128xf32, #tpu.memory_space<vmem>>, vector<1x8x128xf32>,
      }
    } else {
    }
    %c0_i32_15 = arith.constant 0 : i32
    %23 = arith.cmpi eq, %11, %c0_i32_15 : i32
    %24 = arith.extui %23 : i1 to i32
    %c0_i32_16 = arith.constant 0 : i32
    %25 = arith.cmpi ne, %24, %c0_i32_16 : i32
    scf.if %25 {
      %cst = arith.constant 0.000000e+00 : f32
      %43 = vector.broadcast %cst : f32 to vector<8x8x128xf32>
      %c0_30 = arith.constant 0 : index
      %c0_31 = arith.constant 0 : index
      %c0_32 = arith.constant 0 : index
      %44 = vector.load %arg13[%c0_30, %c0_31, %c0_32] : memref<8x8x128xf32, #tpu.memory_space<vmem>>, vector<8x8x128xf32>
      tpu.vector_store %arg13[%c0_30, %c0_31, %c0_32], %43 {strides = array<i32>} : memref<8x8x128xf32, #tpu.memory_space<vmem>>, vector<8x8x128xf32>,
    } else {
    }
    %c0_i32_17 = arith.constant 0 : i32
    %26 = arith.cmpi sgt, %11, %c0_i32_17 : i32
    %27 = arith.extui %26 : i1 to i32
    %c0_i32_18 = arith.constant 0 : i32
    %28 = arith.cmpi ne, %27, %c0_i32_18 : i32
    scf.if %28 {
      %c0_30 = arith.constant 0 : index
      %c0_31 = arith.constant 0 : index
      %c0_32 = arith.constant 0 : index
      %43 = vector.load %arg4[%c0_30, %c0_31, %c0_32] : memref<8x8x16xf32, #tpu.memory_space<vmem>>, vector<8x8x16xf32>
      %44 = vector.shape_cast %43 : vector<8x8x16xf32> to vector<64x16xf32>
      %c0_33 = arith.constant 0 : index
      %c0_34 = arith.constant 0 : index
      %45 = vector.load %arg7[%c0_33, %c0_34] : memref<16x384xf32, #tpu.memory_space<vmem>>, vector<16x384xf32>
      %cst = arith.constant dense<0.000000e+00> : vector<64x384xf32>
      %46 = tpu.matmul %44, %45, %cst {dimension_numbers = #tpu.dot_dimension_numbers<[1], [0], [0], [1], [0, 0, 1, 1], [], []>} : vector<64x16xf32>, vector<16x384xf32>, vector<64x384xf32> -> vector<64x384xf32>
      %c1_35 = arith.constant 1 : index
      %c0_36 = arith.constant 0 : index
      %47 = vector.load %arg10[%c1_35, %c0_36] : memref<2x384xf32, #tpu.memory_space<vmem>>, vector<1x384xf32>
      %48 = vector.broadcast %47 : vector<1x384xf32> to vector<64x384xf32>
      %49 = arith.addf %46, %48 : vector<64x384xf32>
      %50 = vector.shape_cast %49 : vector<64x384xf32> to vector<8x8x384xf32>
      %c0_37 = arith.constant 0 : index
      %c0_38 = arith.constant 0 : index
      %c0_39 = arith.constant 0 : index
      %51 = vector.load %arg15[%c0_37, %c0_38, %c0_39] : memref<8x8x384xf32, #tpu.memory_space<vmem>>, vector<8x8x384xf32>
      tpu.vector_store %arg15[%c0_37, %c0_38, %c0_39], %50 {strides = array<i32>} : memref<8x8x384xf32, #tpu.memory_space<vmem>>, vector<8x8x384xf32>,
      %c0_i32_40 = arith.constant 0 : i32
      %c8_i32_41 = arith.constant 8 : i32
      %52 = arith.subi %c8_i32_41, %11 : i32
      %53 = arith.addi %11, %52 : i32
      %c1_i32_42 = arith.constant 1 : i32
      scf.for %arg18 = %11 to %53 step %c1_i32_42  : i32 {
        %cst_43 = arith.constant 0.000000e+00 : f32
        %54 = vector.broadcast %cst_43 : f32 to vector<8x128xf32>
        %55 = arith.index_cast %arg18 : i32 to index
        %c0_44 = arith.constant 0 : index
        %c0_45 = arith.constant 0 : index
        %56 = vector.load %arg13[%55, %c0_44, %c0_45] : memref<8x8x128xf32, #tpu.memory_space<vmem>>, vector<1x8x128xf32>
        %57 = vector.shape_cast %56 : vector<1x8x128xf32> to vector<8x128xf32>
        %58 = vector.shape_cast %54 : vector<8x128xf32> to vector<1x8x128xf32>
        tpu.vector_store %arg13[%55, %c0_44, %c0_45], %58 {strides = array<i32>} : memref<8x8x128xf32, #tpu.memory_space<vmem>>, vector<1x8x128xf32>,
      }
    } else {
    }
    %29 = arith.minsi %8, %11 : i32
    %c0_19 = arith.constant 0 : index
    %c0_20 = arith.constant 0 : index
    %30 = vector.load %arg16[%c0_19, %c0_20] : memref<8x128xf32, #tpu.memory_space<vmem>>, vector<8x128xf32>
    %c0_21 = arith.constant 0 : index
    %c0_22 = arith.constant 0 : index
    %31 = vector.load %arg17[%c0_21, %c0_22] : memref<8x128xf32, #tpu.memory_space<vmem>>, vector<8x128xf32>
    %c0_i32_23 = arith.constant 0 : i32
    %32 = arith.subi %29, %c0_i32_23 : i32
    %33 = arith.addi %c0_i32_23, %32 : i32
    %c1_i32 = arith.constant 1 : i32
    %34:2 = scf.for %arg18 = %c0_i32_23 to %33 step %c1_i32 iter_args(%arg19 = %30, %arg20 = %31) -> (vector<8x128xf32>, vector<8x128xf32>)  : i32 {
      %43 = arith.index_cast %arg18 : i32 to index
      %c0_30 = arith.constant 0 : index
      %c0_31 = arith.constant 0 : index
      %44 = vector.load %arg14[%43, %c0_30, %c0_31] : memref<8x8x384xf32, #tpu.memory_space<vmem>>, vector<1x8x384xf32>
      %45 = vector.shape_cast %44 : vector<1x8x384xf32> to vector<8x384xf32>
      %c0_32 = arith.constant 0 : index
      %c0_33 = arith.constant 0 : index
      %46 = vector.load %arg8[%c0_32, %c0_33] : memref<128x384xf32, #tpu.memory_space<vmem>>, vector<128x384xf32>
      %cst = arith.constant dense<0.000000e+00> : vector<8x384xf32>
      %47 = tpu.matmul %arg19, %46, %cst {dimension_numbers = #tpu.dot_dimension_numbers<[1], [0], [0], [1], [0, 0, 1, 1], [], []>} : vector<8x128xf32>, vector<128x384xf32>, vector<8x384xf32> -> vector<8x384xf32>
      %48 = vector.extract_strided_slice %45 {offsets = [0, 0], sizes = [8, 128], strides = [1, 1]} : vector<8x384xf32> to vector<8x128xf32>
      %49 = vector.extract_strided_slice %47 {offsets = [0, 0], sizes = [8, 128], strides = [1, 1]} : vector<8x384xf32> to vector<8x128xf32>
      %50 = arith.addf %48, %49 : vector<8x128xf32>
      %51 = arith.negf %50 : vector<8x128xf32>
      %52 = math.exp %51 : vector<8x128xf32>
      %cst_34 = arith.constant 1.000000e+00 : f32
      %53 = vector.broadcast %cst_34 : f32 to vector<8x128xf32>
      %54 = arith.addf %53, %52 : vector<8x128xf32>
      %55 = arith.divf %53, %54 : vector<8x128xf32>
      %56 = vector.extract_strided_slice %45 {offsets = [0, 128], sizes = [8, 128], strides = [1, 1]} : vector<8x384xf32> to vector<8x128xf32>
      %57 = vector.extract_strided_slice %47 {offsets = [0, 128], sizes = [8, 128], strides = [1, 1]} : vector<8x384xf32> to vector<8x128xf32>
      %58 = arith.addf %56, %57 : vector<8x128xf32>
      %59 = arith.negf %58 : vector<8x128xf32>
      %60 = math.exp %59 : vector<8x128xf32>
      %cst_35 = arith.constant 1.000000e+00 : f32
      %61 = vector.broadcast %cst_35 : f32 to vector<8x128xf32>
      %62 = arith.addf %61, %60 : vector<8x128xf32>
      %63 = arith.divf %61, %62 : vector<8x128xf32>
      %64 = vector.extract_strided_slice %45 {offsets = [0, 256], sizes = [8, 128], strides = [1, 1]} : vector<8x384xf32> to vector<8x128xf32>
      %65 = vector.extract_strided_slice %47 {offsets = [0, 256], sizes = [8, 128], strides = [1, 1]} : vector<8x384xf32> to vector<8x128xf32>
      %66 = vector.broadcast %15 : vector<1x128xf32> to vector<8x128xf32>
      %67 = arith.addf %65, %66 : vector<8x128xf32>
      %68 = arith.mulf %55, %67 : vector<8x128xf32>
      %69 = arith.addf %64, %68 : vector<8x128xf32>
      %70 = math.tanh %69 : vector<8x128xf32>
      %cst_36 = arith.constant 1.000000e+00 : f32
      %71 = vector.broadcast %cst_36 : f32 to vector<8x128xf32>
      %72 = arith.subf %71, %63 : vector<8x128xf32>
      %73 = arith.mulf %72, %70 : vector<8x128xf32>
      %74 = arith.mulf %63, %arg19 : vector<8x128xf32>
      %75 = arith.addf %73, %74 : vector<8x128xf32>
      %76 = arith.addi %3, %arg18 : i32
      %77 = vector.broadcast %76 : i32 to vector<8x1xi32>
      %78 = arith.cmpi slt, %77, %2 : vector<8x1xi32>
      %cst_37 = arith.constant 0.000000e+00 : f32
      %79 = vector.shape_cast %78 : vector<8x1xi1> to vector<8x1xi1>
      %80 = vector.broadcast %79 : vector<8x1xi1> to vector<8x128xi1>
      %81 = vector.broadcast %cst_37 : f32 to vector<8x128xf32>
      %82 = arith.select %80, %75, %81 : vector<8x128xi1>, vector<8x128xf32>
      %83 = arith.index_cast %arg18 : i32 to index
      %c0_38 = arith.constant 0 : index
      %c0_39 = arith.constant 0 : index
      %84 = vector.load %arg12[%83, %c0_38, %c0_39] : memref<8x8x128xf32, #tpu.memory_space<vmem>>, vector<1x8x128xf32>
      %85 = vector.shape_cast %84 : vector<1x8x128xf32> to vector<8x128xf32>
      %86 = vector.shape_cast %82 : vector<8x128xf32> to vector<1x8x128xf32>
      tpu.vector_store %arg12[%83, %c0_38, %c0_39], %86 {strides = array<i32>} : memref<8x8x128xf32, #tpu.memory_space<vmem>>, vector<1x8x128xf32>,
      %87 = vector.shape_cast %78 : vector<8x1xi1> to vector<8x1xi1>
      %88 = vector.broadcast %87 : vector<8x1xi1> to vector<8x128xi1>
      %89 = arith.select %88, %75, %arg19 : vector<8x128xi1>, vector<8x128xf32>
      %c1_i32_40 = arith.constant 1 : i32
      %90 = arith.subi %11, %c1_i32_40 : i32
      %91 = arith.subi %90, %arg18 : i32
      %92 = arith.index_cast %91 : i32 to index
      %c0_41 = arith.constant 0 : index
      %c0_42 = arith.constant 0 : index
      %93 = vector.load %arg15[%92, %c0_41, %c0_42] : memref<8x8x384xf32, #tpu.memory_space<vmem>>, vector<1x8x384xf32>
      %94 = vector.shape_cast %93 : vector<1x8x384xf32> to vector<8x384xf32>
      %c0_43 = arith.constant 0 : index
      %c0_44 = arith.constant 0 : index
      %95 = vector.load %arg9[%c0_43, %c0_44] : memref<128x384xf32, #tpu.memory_space<vmem>>, vector<128x384xf32>
      %cst_45 = arith.constant dense<0.000000e+00> : vector<8x384xf32>
      %96 = tpu.matmul %arg20, %95, %cst_45 {dimension_numbers = #tpu.dot_dimension_numbers<[1], [0], [0], [1], [0, 0, 1, 1], [], []>} : vector<8x128xf32>, vector<128x384xf32>, vector<8x384xf32> -> vector<8x384xf32>
      %97 = vector.extract_strided_slice %94 {offsets = [0, 0], sizes = [8, 128], strides = [1, 1]} : vector<8x384xf32> to vector<8x128xf32>
      %98 = vector.extract_strided_slice %96 {offsets = [0, 0], sizes = [8, 128], strides = [1, 1]} : vector<8x384xf32> to vector<8x128xf32>
      %99 = arith.addf %97, %98 : vector<8x128xf32>
      %100 = arith.negf %99 : vector<8x128xf32>
      %101 = math.exp %100 : vector<8x128xf32>
      %cst_46 = arith.constant 1.000000e+00 : f32
      %102 = vector.broadcast %cst_46 : f32 to vector<8x128xf32>
      %103 = arith.addf %102, %101 : vector<8x128xf32>
      %104 = arith.divf %102, %103 : vector<8x128xf32>
      %105 = vector.extract_strided_slice %94 {offsets = [0, 128], sizes = [8, 128], strides = [1, 1]} : vector<8x384xf32> to vector<8x128xf32>
      %106 = vector.extract_strided_slice %96 {offsets = [0, 128], sizes = [8, 128], strides = [1, 1]} : vector<8x384xf32> to vector<8x128xf32>
      %107 = arith.addf %105, %106 : vector<8x128xf32>
      %108 = arith.negf %107 : vector<8x128xf32>
      %109 = math.exp %108 : vector<8x128xf32>
      %cst_47 = arith.constant 1.000000e+00 : f32
      %110 = vector.broadcast %cst_47 : f32 to vector<8x128xf32>
      %111 = arith.addf %110, %109 : vector<8x128xf32>
      %112 = arith.divf %110, %111 : vector<8x128xf32>
      %113 = vector.extract_strided_slice %94 {offsets = [0, 256], sizes = [8, 128], strides = [1, 1]} : vector<8x384xf32> to vector<8x128xf32>
      %114 = vector.extract_strided_slice %96 {offsets = [0, 256], sizes = [8, 128], strides = [1, 1]} : vector<8x384xf32> to vector<8x128xf32>
      %115 = vector.broadcast %16 : vector<1x128xf32> to vector<8x128xf32>
      %116 = arith.addf %114, %115 : vector<8x128xf32>
      %117 = arith.mulf %104, %116 : vector<8x128xf32>
      %118 = arith.addf %113, %117 : vector<8x128xf32>
      %119 = math.tanh %118 : vector<8x128xf32>
      %cst_48 = arith.constant 1.000000e+00 : f32
      %120 = vector.broadcast %cst_48 : f32 to vector<8x128xf32>
      %121 = arith.subf %120, %112 : vector<8x128xf32>
      %122 = arith.mulf %121, %119 : vector<8x128xf32>
      %123 = arith.mulf %112, %arg20 : vector<8x128xf32>
      %124 = arith.addf %122, %123 : vector<8x128xf32>
      %125 = arith.addi %5, %91 : i32
      %126 = vector.broadcast %125 : i32 to vector<8x1xi32>
      %127 = arith.cmpi slt, %126, %2 : vector<8x1xi32>
      %cst_49 = arith.constant 0.000000e+00 : f32
      %128 = vector.shape_cast %127 : vector<8x1xi1> to vector<8x1xi1>
      %129 = vector.broadcast %128 : vector<8x1xi1> to vector<8x128xi1>
      %130 = vector.broadcast %cst_49 : f32 to vector<8x128xf32>
      %131 = arith.select %129, %124, %130 : vector<8x128xi1>, vector<8x128xf32>
      %132 = arith.index_cast %91 : i32 to index
      %c0_50 = arith.constant 0 : index
      %c0_51 = arith.constant 0 : index
      %133 = vector.load %arg13[%132, %c0_50, %c0_51] : memref<8x8x128xf32, #tpu.memory_space<vmem>>, vector<1x8x128xf32>
      %134 = vector.shape_cast %133 : vector<1x8x128xf32> to vector<8x128xf32>
      %135 = vector.shape_cast %131 : vector<8x128xf32> to vector<1x8x128xf32>
      tpu.vector_store %arg13[%132, %c0_50, %c0_51], %135 {strides = array<i32>} : memref<8x8x128xf32, #tpu.memory_space<vmem>>, vector<1x8x128xf32>,
      %136 = vector.shape_cast %127 : vector<8x1xi1> to vector<8x1xi1>
      %137 = vector.broadcast %136 : vector<8x1xi1> to vector<8x128xi1>
      %138 = arith.select %137, %124, %arg20 : vector<8x128xi1>, vector<8x128xf32>
      scf.yield %89, %138 : vector<8x128xf32>, vector<8x128xf32>
    }
    %35 = arith.subi %8, %29 : i32
    %36 = arith.addi %29, %35 : i32
    %c1_i32_24 = arith.constant 1 : i32
    %37 = scf.for %arg18 = %29 to %36 step %c1_i32_24 iter_args(%arg19 = %34#0) -> (vector<8x128xf32>)  : i32 {
      %43 = arith.index_cast %arg18 : i32 to index
      %c0_30 = arith.constant 0 : index
      %c0_31 = arith.constant 0 : index
      %44 = vector.load %arg14[%43, %c0_30, %c0_31] : memref<8x8x384xf32, #tpu.memory_space<vmem>>, vector<1x8x384xf32>
      %45 = vector.shape_cast %44 : vector<1x8x384xf32> to vector<8x384xf32>
      %c0_32 = arith.constant 0 : index
      %c0_33 = arith.constant 0 : index
      %46 = vector.load %arg8[%c0_32, %c0_33] : memref<128x384xf32, #tpu.memory_space<vmem>>, vector<128x384xf32>
      %cst = arith.constant dense<0.000000e+00> : vector<8x384xf32>
      %47 = tpu.matmul %arg19, %46, %cst {dimension_numbers = #tpu.dot_dimension_numbers<[1], [0], [0], [1], [0, 0, 1, 1], [], []>} : vector<8x128xf32>, vector<128x384xf32>, vector<8x384xf32> -> vector<8x384xf32>
      %48 = vector.extract_strided_slice %45 {offsets = [0, 0], sizes = [8, 128], strides = [1, 1]} : vector<8x384xf32> to vector<8x128xf32>
      %49 = vector.extract_strided_slice %47 {offsets = [0, 0], sizes = [8, 128], strides = [1, 1]} : vector<8x384xf32> to vector<8x128xf32>
      %50 = arith.addf %48, %49 : vector<8x128xf32>
      %51 = arith.negf %50 : vector<8x128xf32>
      %52 = math.exp %51 : vector<8x128xf32>
      %cst_34 = arith.constant 1.000000e+00 : f32
      %53 = vector.broadcast %cst_34 : f32 to vector<8x128xf32>
      %54 = arith.addf %53, %52 : vector<8x128xf32>
      %55 = arith.divf %53, %54 : vector<8x128xf32>
      %56 = vector.extract_strided_slice %45 {offsets = [0, 128], sizes = [8, 128], strides = [1, 1]} : vector<8x384xf32> to vector<8x128xf32>
      %57 = vector.extract_strided_slice %47 {offsets = [0, 128], sizes = [8, 128], strides = [1, 1]} : vector<8x384xf32> to vector<8x128xf32>
      %58 = arith.addf %56, %57 : vector<8x128xf32>
      %59 = arith.negf %58 : vector<8x128xf32>
      %60 = math.exp %59 : vector<8x128xf32>
      %cst_35 = arith.constant 1.000000e+00 : f32
      %61 = vector.broadcast %cst_35 : f32 to vector<8x128xf32>
      %62 = arith.addf %61, %60 : vector<8x128xf32>
      %63 = arith.divf %61, %62 : vector<8x128xf32>
      %64 = vector.extract_strided_slice %45 {offsets = [0, 256], sizes = [8, 128], strides = [1, 1]} : vector<8x384xf32> to vector<8x128xf32>
      %65 = vector.extract_strided_slice %47 {offsets = [0, 256], sizes = [8, 128], strides = [1, 1]} : vector<8x384xf32> to vector<8x128xf32>
      %66 = vector.broadcast %15 : vector<1x128xf32> to vector<8x128xf32>
      %67 = arith.addf %65, %66 : vector<8x128xf32>
      %68 = arith.mulf %55, %67 : vector<8x128xf32>
      %69 = arith.addf %64, %68 : vector<8x128xf32>
      %70 = math.tanh %69 : vector<8x128xf32>
      %cst_36 = arith.constant 1.000000e+00 : f32
      %71 = vector.broadcast %cst_36 : f32 to vector<8x128xf32>
      %72 = arith.subf %71, %63 : vector<8x128xf32>
      %73 = arith.mulf %72, %70 : vector<8x128xf32>
      %74 = arith.mulf %63, %arg19 : vector<8x128xf32>
      %75 = arith.addf %73, %74 : vector<8x128xf32>
      %76 = arith.addi %3, %arg18 : i32
      %77 = vector.broadcast %76 : i32 to vector<8x1xi32>
      %78 = arith.cmpi slt, %77, %2 : vector<8x1xi32>
      %cst_37 = arith.constant 0.000000e+00 : f32
      %79 = vector.shape_cast %78 : vector<8x1xi1> to vector<8x1xi1>
      %80 = vector.broadcast %79 : vector<8x1xi1> to vector<8x128xi1>
      %81 = vector.broadcast %cst_37 : f32 to vector<8x128xf32>
      %82 = arith.select %80, %75, %81 : vector<8x128xi1>, vector<8x128xf32>
      %83 = arith.index_cast %arg18 : i32 to index
      %c0_38 = arith.constant 0 : index
      %c0_39 = arith.constant 0 : index
      %84 = vector.load %arg12[%83, %c0_38, %c0_39] : memref<8x8x128xf32, #tpu.memory_space<vmem>>, vector<1x8x128xf32>
      %85 = vector.shape_cast %84 : vector<1x8x128xf32> to vector<8x128xf32>
      %86 = vector.shape_cast %82 : vector<8x128xf32> to vector<1x8x128xf32>
      tpu.vector_store %arg12[%83, %c0_38, %c0_39], %86 {strides = array<i32>} : memref<8x8x128xf32, #tpu.memory_space<vmem>>, vector<1x8x128xf32>,
      %87 = vector.shape_cast %78 : vector<8x1xi1> to vector<8x1xi1>
      %88 = vector.broadcast %87 : vector<8x1xi1> to vector<8x128xi1>
      %89 = arith.select %88, %75, %arg19 : vector<8x128xi1>, vector<8x128xf32>
      scf.yield %89 : vector<8x128xf32>
    }
    %38 = arith.subi %11, %29 : i32
    %39 = arith.addi %29, %38 : i32
    %c1_i32_25 = arith.constant 1 : i32
    %40 = scf.for %arg18 = %29 to %39 step %c1_i32_25 iter_args(%arg19 = %34#1) -> (vector<8x128xf32>)  : i32 {
      %c1_i32_30 = arith.constant 1 : i32
      %43 = arith.subi %11, %c1_i32_30 : i32
      %44 = arith.subi %43, %arg18 : i32
      %45 = arith.index_cast %44 : i32 to index
      %c0_31 = arith.constant 0 : index
      %c0_32 = arith.constant 0 : index
      %46 = vector.load %arg15[%45, %c0_31, %c0_32] : memref<8x8x384xf32, #tpu.memory_space<vmem>>, vector<1x8x384xf32>
      %47 = vector.shape_cast %46 : vector<1x8x384xf32> to vector<8x384xf32>
      %c0_33 = arith.constant 0 : index
      %c0_34 = arith.constant 0 : index
      %48 = vector.load %arg9[%c0_33, %c0_34] : memref<128x384xf32, #tpu.memory_space<vmem>>, vector<128x384xf32>
      %cst = arith.constant dense<0.000000e+00> : vector<8x384xf32>
      %49 = tpu.matmul %arg19, %48, %cst {dimension_numbers = #tpu.dot_dimension_numbers<[1], [0], [0], [1], [0, 0, 1, 1], [], []>} : vector<8x128xf32>, vector<128x384xf32>, vector<8x384xf32> -> vector<8x384xf32>
      %50 = vector.extract_strided_slice %47 {offsets = [0, 0], sizes = [8, 128], strides = [1, 1]} : vector<8x384xf32> to vector<8x128xf32>
      %51 = vector.extract_strided_slice %49 {offsets = [0, 0], sizes = [8, 128], strides = [1, 1]} : vector<8x384xf32> to vector<8x128xf32>
      %52 = arith.addf %50, %51 : vector<8x128xf32>
      %53 = arith.negf %52 : vector<8x128xf32>
      %54 = math.exp %53 : vector<8x128xf32>
      %cst_35 = arith.constant 1.000000e+00 : f32
      %55 = vector.broadcast %cst_35 : f32 to vector<8x128xf32>
      %56 = arith.addf %55, %54 : vector<8x128xf32>
      %57 = arith.divf %55, %56 : vector<8x128xf32>
      %58 = vector.extract_strided_slice %47 {offsets = [0, 128], sizes = [8, 128], strides = [1, 1]} : vector<8x384xf32> to vector<8x128xf32>
      %59 = vector.extract_strided_slice %49 {offsets = [0, 128], sizes = [8, 128], strides = [1, 1]} : vector<8x384xf32> to vector<8x128xf32>
      %60 = arith.addf %58, %59 : vector<8x128xf32>
      %61 = arith.negf %60 : vector<8x128xf32>
      %62 = math.exp %61 : vector<8x128xf32>
      %cst_36 = arith.constant 1.000000e+00 : f32
      %63 = vector.broadcast %cst_36 : f32 to vector<8x128xf32>
      %64 = arith.addf %63, %62 : vector<8x128xf32>
      %65 = arith.divf %63, %64 : vector<8x128xf32>
      %66 = vector.extract_strided_slice %47 {offsets = [0, 256], sizes = [8, 128], strides = [1, 1]} : vector<8x384xf32> to vector<8x128xf32>
      %67 = vector.extract_strided_slice %49 {offsets = [0, 256], sizes = [8, 128], strides = [1, 1]} : vector<8x384xf32> to vector<8x128xf32>
      %68 = vector.broadcast %16 : vector<1x128xf32> to vector<8x128xf32>
      %69 = arith.addf %67, %68 : vector<8x128xf32>
      %70 = arith.mulf %57, %69 : vector<8x128xf32>
      %71 = arith.addf %66, %70 : vector<8x128xf32>
      %72 = math.tanh %71 : vector<8x128xf32>
      %cst_37 = arith.constant 1.000000e+00 : f32
      %73 = vector.broadcast %cst_37 : f32 to vector<8x128xf32>
      %74 = arith.subf %73, %65 : vector<8x128xf32>
      %75 = arith.mulf %74, %72 : vector<8x128xf32>
      %76 = arith.mulf %65, %arg19 : vector<8x128xf32>
      %77 = arith.addf %75, %76 : vector<8x128xf32>
      %78 = arith.addi %5, %44 : i32
      %79 = vector.broadcast %78 : i32 to vector<8x1xi32>
      %80 = arith.cmpi slt, %79, %2 : vector<8x1xi32>
      %cst_38 = arith.constant 0.000000e+00 : f32
      %81 = vector.shape_cast %80 : vector<8x1xi1> to vector<8x1xi1>
      %82 = vector.broadcast %81 : vector<8x1xi1> to vector<8x128xi1>
      %83 = vector.broadcast %cst_38 : f32 to vector<8x128xf32>
      %84 = arith.select %82, %77, %83 : vector<8x128xi1>, vector<8x128xf32>
      %85 = arith.index_cast %44 : i32 to index
      %c0_39 = arith.constant 0 : index
      %c0_40 = arith.constant 0 : index
      %86 = vector.load %arg13[%85, %c0_39, %c0_40] : memref<8x8x128xf32, #tpu.memory_space<vmem>>, vector<1x8x128xf32>
      %87 = vector.shape_cast %86 : vector<1x8x128xf32> to vector<8x128xf32>
      %88 = vector.shape_cast %84 : vector<8x128xf32> to vector<1x8x128xf32>
      tpu.vector_store %arg13[%85, %c0_39, %c0_40], %88 {strides = array<i32>} : memref<8x8x128xf32, #tpu.memory_space<vmem>>, vector<1x8x128xf32>,
      %89 = vector.shape_cast %80 : vector<8x1xi1> to vector<8x1xi1>
      %90 = vector.broadcast %89 : vector<8x1xi1> to vector<8x128xi1>
      %91 = arith.select %90, %77, %arg19 : vector<8x128xi1>, vector<8x128xf32>
      scf.yield %91 : vector<8x128xf32>
    }
    %c0_26 = arith.constant 0 : index
    %c0_27 = arith.constant 0 : index
    %41 = vector.load %arg16[%c0_26, %c0_27] : memref<8x128xf32, #tpu.memory_space<vmem>>, vector<8x128xf32>
    tpu.vector_store %arg16[%c0_26, %c0_27], %37 {strides = array<i32>} : memref<8x128xf32, #tpu.memory_space<vmem>>, vector<8x128xf32>,
    %c0_28 = arith.constant 0 : index
    %c0_29 = arith.constant 0 : index
    %42 = vector.load %arg17[%c0_28, %c0_29] : memref<8x128xf32, #tpu.memory_space<vmem>>, vector<8x128xf32>
    tpu.vector_store %arg17[%c0_28, %c0_29], %40 {strides = array<i32>} : memref<8x128xf32, #tpu.memory_space<vmem>>, vector<8x128xf32>,
    return
  }
  func.func @transform_0(%arg0: i32, %arg1: i32, %arg2: memref<1xi32, #tpu.memory_space<smem>>) -> (i32, i32, i32) {
    %c0_i32 = arith.constant 0 : i32
    %c0_i32_0 = arith.constant 0 : i32
    return %arg1, %arg0, %c0_i32 : i32, i32, i32
  }
  func.func @transform_1(%arg0: i32, %arg1: i32, %arg2: memref<1xi32, #tpu.memory_space<smem>>) -> (i32, i32, i32) {
    %c0_i32 = arith.constant 0 : i32
    %0 = arith.subi %c0_i32, %arg1 : i32
    %c0_i32_0 = arith.constant 0 : i32
    %c0_i32_1 = arith.constant 0 : i32
    return %0, %arg0, %c0_i32_0 : i32, i32, i32
  }
  func.func @transform_2(%arg0: i32, %arg1: i32, %arg2: memref<1xi32, #tpu.memory_space<smem>>) -> (i32, i32) {
    %c0_i32 = arith.constant 0 : i32
    %c0_i32_0 = arith.constant 0 : i32
    return %arg0, %c0_i32 : i32, i32
  }
  func.func @transform_3(%arg0: i32, %arg1: i32, %arg2: memref<1xi32, #tpu.memory_space<smem>>) -> (i32, i32) {
    %c0_i32 = arith.constant 0 : i32
    %c0_i32_0 = arith.constant 0 : i32
    %c0_i32_1 = arith.constant 0 : i32
    return %c0_i32, %c0_i32_0 : i32, i32
  }
  func.func @transform_4(%arg0: i32, %arg1: i32, %arg2: memref<1xi32, #tpu.memory_space<smem>>) -> (i32, i32) {
    %c0_i32 = arith.constant 0 : i32
    %c0_i32_0 = arith.constant 0 : i32
    %c0_i32_1 = arith.constant 0 : i32
    return %c0_i32, %c0_i32_0 : i32, i32
  }
  func.func @transform_5(%arg0: i32, %arg1: i32, %arg2: memref<1xi32, #tpu.memory_space<smem>>) -> (i32, i32) {
    %c0_i32 = arith.constant 0 : i32
    %c0_i32_0 = arith.constant 0 : i32
    %c0_i32_1 = arith.constant 0 : i32
    return %c0_i32, %c0_i32_0 : i32, i32
  }
  func.func @transform_6(%arg0: i32, %arg1: i32, %arg2: memref<1xi32, #tpu.memory_space<smem>>) -> (i32, i32) {
    %c0_i32 = arith.constant 0 : i32
    %c0_i32_0 = arith.constant 0 : i32
    %c0_i32_1 = arith.constant 0 : i32
    return %c0_i32, %c0_i32_0 : i32, i32
  }
  func.func @transform_7(%arg0: i32, %arg1: i32, %arg2: memref<1xi32, #tpu.memory_space<smem>>) -> (i32, i32) {
    %c0_i32 = arith.constant 0 : i32
    %c0_i32_0 = arith.constant 0 : i32
    %c0_i32_1 = arith.constant 0 : i32
    return %c0_i32, %c0_i32_0 : i32, i32
  }
  func.func @transform_8(%arg0: i32, %arg1: i32, %arg2: memref<1xi32, #tpu.memory_space<smem>>) -> (i32, i32) {
    %c0_i32 = arith.constant 0 : i32
    %c0_i32_0 = arith.constant 0 : i32
    %c0_i32_1 = arith.constant 0 : i32
    return %c0_i32, %c0_i32_0 : i32, i32
  }
  func.func @transform_9(%arg0: i32, %arg1: i32, %arg2: memref<1xi32, #tpu.memory_space<smem>>) -> (i32, i32, i32) {
    %c0_i32 = arith.constant 0 : i32
    %c0_i32_0 = arith.constant 0 : i32
    return %arg1, %arg0, %c0_i32 : i32, i32, i32
  }
  func.func @transform_10(%arg0: i32, %arg1: i32, %arg2: memref<1xi32, #tpu.memory_space<smem>>) -> (i32, i32, i32) {
    %c0_i32 = arith.constant 0 : i32
    %0 = arith.subi %c0_i32, %arg1 : i32
    %c0_i32_0 = arith.constant 0 : i32
    %c0_i32_1 = arith.constant 0 : i32
    return %0, %arg0, %c0_i32_0 : i32, i32, i32
  }
}

</mosaic_0001>

<bundles_post_ra>
// kernel: tpu_custom_call.1
= control target key start
LH: loop header
LB: loop body
LE: loop exit
PB: predicated region body
PF: predicated region fallthrough
CT: control target
= control target key end

     0   :  { %18 = vsyncpa [#allocation9], 0  ;;  %s2259_s0 = inlined_call_operand.<no memory space> [shape: s32[1], index: 0, kind: input, shape index: {}]   ;;  %s2260_s1 = inlined_call_operand.hbm [shape: f32[8,8,16], index: 1, kind: input, shape index: {}]   ;;  %s2261_s2 = inlined_call_operand.hbm [shape: f32[8,8,16], index: 2, kind: input, shape index: {}]   ;;  %s2262_s3 = inlined_call_operand.vmem [shape: s32[8,1], index: 3, kind: input, shape index: {}]   ;;  %s2263_s4 = inlined_call_operand.hbm [shape: f32[16,384], index: 4, kind: input, shape index: {}]   ;;  %s2264_s5 = inlined_call_operand.hbm [shape: f32[16,384], index: 5, kind: input, shape index: {}]   ;;  %s2265_s6 = inlined_call_operand.hbm [shape: f32[128,384], index: 6, kind: input, shape index: {}]   ;;  %s2266_s7 = inlined_call_operand.hbm [shape: f32[128,384], index: 7, kind: input, shape index: {}]   ;;  %s2267_s8 = inlined_call_operand.vmem [shape: f32[2,384], index: 8, kind: input, shape index: {}]   ;;  %s2268_s9 = inlined_call_operand.vmem [shape: f32[2,128], index: 9, kind: input, shape index: {}]   ;;  %s2269_s10 = inlined_call_operand.hbm [shape: f32[8,8,128], index: 10, kind: output, shape index: {0}]   ;;  %s2270_s11 = inlined_call_operand.hbm [shape: f32[8,8,128], index: 11, kind: output, shape index: {1}]  }
   0x1   :  { %19 = vsyncpa [#allocation12], 0 }
   0x2   :  { %20 = vsyncpa [#allocation15], 0 }
   0x3   :  { %21 = vsyncpa [#allocation18], 0 }
   0x4   :  { %22 = vsyncpa [#allocation10], 0 }
   0x5   :  { %23 = vsyncpa [#allocation21], 0  ;;  %s45_s19 = sshll.u32 %s2261_s2, 4  ;;  %s1902_s20 = smov [#allocation11]   ;;  %s46_s19 = int_to_ptr.hbm [resolvable:$true] %s45_s19 }
   0x6   :  { %s47_s21 = sshll.u32 %s1902_s20, 4  ;;  %s1903_s22 = smov 128   ;;  %s48_s21 = int_to_ptr.vmem [resolvable:$true] %s47_s21 }
   0x7   :  { %s1904_s23 = smov 8   ;;  %s73_s26 = sshll.u32 %s2264_s5, 4  ;;  %s74_s26 = int_to_ptr.hbm [resolvable:$true] %s73_s26 }
   0x8   :  { %53 = dma.hbm_to_vmem [thread:$0]  %s46_s19, 1024, %s48_s21, [#allocation12], %s1903_s22, %s1903_s22, %s1904_s23  }
   0x9   :  { %s1905_s27 = smov [#allocation14]   ;;  %s28_s2 = sshll.u32 %s2260_s1, 4  ;;  %s29_s2 = int_to_ptr.hbm [resolvable:$true] %s28_s2 }
   0xa   :  { %s75_s28 = sshll.u32 %s1905_s27, 4  ;;  %s1906_s12 = smov 384   ;;  %s76_s28 = int_to_ptr.vmem [resolvable:$true] %s75_s28 }
   0xb   :  { %s1907_s13 = smov 24   ;;  %s60_s16 = sshll.u32 %s2263_s4, 4  ;;  %s61_s16 = int_to_ptr.hbm [resolvable:$true] %s60_s16 }
   0xc   :  { %81 = dma.hbm_to_vmem [thread:$0]  %s74_s26, 768, %s76_s28, [#allocation15], %s1906_s12, %s1906_s12, %s1907_s13  }
   0xd   :  { %s1908_s17 = smov [#allocation8]   ;;  %s1909_s5 = smov [#allocation13]  }
   0xe   :  { %s30_s18 = sshll.u32 %s1908_s17, 4  ;;  %s62_s19 = sshll.u32 %s1909_s5, 4  ;;  %s31_s18 = int_to_ptr.vmem [resolvable:$true] %s30_s18  ;;  %s63_s19 = int_to_ptr.vmem [resolvable:$true] %s62_s19 }
   0xf   :  { %36 = dma.hbm_to_vmem [thread:$0]  %s29_s2, 1024, %s31_s18, [#allocation9], %s1903_s22, %s1903_s22, %s1904_s23  }
  0x10   :  { %s86_s21 = sshll.u32 %s2265_s6, 4  ;;  %s99_s4 = sshll.u32 %s2266_s7, 4  ;;  %s87_s21 = int_to_ptr.hbm [resolvable:$true] %s86_s21  ;;  %s100_s4 = int_to_ptr.hbm [resolvable:$true] %s99_s4 }
  0x11   :  { %68 = dma.hbm_to_vmem [thread:$0]  %s61_s16, 768, %s63_s19, [#allocation12], %s1906_s12, %s1906_s12, %s1907_s13  }
  0x12   :  { %s1910_s26 = smov [#allocation16]   ;;  %s1911_s28 = smov [#allocation17]  }
  0x13   :  { %s88_s27 = sshll.u32 %s1910_s26, 4  ;;  %s101_s29 = sshll.u32 %s1911_s28, 4  ;;  %s89_s27 = int_to_ptr.vmem [resolvable:$true] %s88_s27  ;;  %s102_s29 = int_to_ptr.vmem [resolvable:$true] %s101_s29 }
  0x14   :  { %94 = dma.hbm_to_vmem [thread:$0]  %s87_s21, 6144, %s89_s27, [#allocation15], %s1906_s12, %s1906_s12, %s1907_s13  }
  0x15   :  { %107 = dma.hbm_to_vmem [thread:$0]  %s100_s4, 6144, %s102_s29, [#allocation18], %s1906_s12, %s1906_s12, %s1907_s13  }
  0x16   :  { %1862 = dma.done.wait [#allocation9], 1024  }
  0x17   :  { %1863 = vsyncadd [#allocation9], 4294966272 }
  0x18   :  { %1864 = dma.done.wait [#allocation12], 1792  }
  0x19   :  { %1865 = vsyncadd [#allocation12], 4294965504 }
  0x1a   :  { %1866 = dma.done.wait [#allocation15], 6912  }
  0x1b   :  { %1867 = vsyncadd [#allocation15], 4294960384 }
  0x1c   :  { %1868 = dma.done.wait [#allocation18], 6144  }
  0x1d   :  { %1869 = vsyncadd [#allocation18], 4294961152  ;;  %p146_p0 = scmp.gt.s32.totalorder %s2259_s0, 0  ;;  %p1443_p1 = scmp.lt.s32.totalorder %s2259_s0, 8  ;;  %v1912_v0 = vmov 0.0   ;;  %v2018_v1 = vld [vmem:[%s2262_s3] sm:$0xff] }
  0x1e   :  { %159 = vst [vmem:[#allocation4] sm:$0xff] %v1912_v0  ;;  %v2023_v2 = vld [vmem:[%s2268_s9] sm:$0x1]  ;;  %v2028_v3 = vld [vmem:[%s2268_s9 + $0x1] sm:$0x1] }
  0x1f   :  { %s2282_s0 = smov (!%p146_p0, %s2259_s0), 0  ;;  %160 = vst [vmem:[#allocation5] sm:$0xff] %v1912_v0 }
  0x20   :  { %s2284_s0 = smov (!%p1443_p1, %s2282_s0), 8 }
  0x21   :  { %p1453_p2 = scmp.ne.s32.totalorder %s2284_s0, 0 }
  0x23   :  { %166 = sbr.rel (%p1453_p2) target bundleno = 49 (0x31), region = 69 }
  0x28   :  { %v1913_v4 = vmov 0.0  }
  0x29   :  { %167 = vst [vmem:[#allocation19] sm:$0xff] %v1913_v4 }
  0x2a   :  { %168 = vst [vmem:[#allocation19 + $0x8] sm:$0xff] %v1913_v4 }
  0x2b   :  { %169 = vst [vmem:[#allocation19 + $0x10] sm:$0xff] %v1913_v4 }
  0x2c   :  { %170 = vst [vmem:[#allocation19 + $0x18] sm:$0xff] %v1913_v4 }
  0x2d   :  { %171 = vst [vmem:[#allocation19 + $0x20] sm:$0xff] %v1913_v4 }
  0x2e   :  { %172 = vst [vmem:[#allocation19 + $0x28] sm:$0xff] %v1913_v4 }
  0x2f   :  { %173 = vst [vmem:[#allocation19 + $0x30] sm:$0xff] %v1913_v4 }
  0x30   :  { %174 = vst [vmem:[#allocation19 + $0x38] sm:$0xff] %v1913_v4 }
  0x31 PF:  { %p1454_p3 = scmp.le.s32.totalorder %s2284_s0, 0 }
  0x32   :  { %p1407_p4 = scmp.ge.s32.totalorder (!%p1454_p3), %s2284_s0, 8 }
  0x33   :  { %178 = sbr.rel (%p1454_p3) target bundleno = 244 (0xf4), region = 73 }
  0x38   :  { %v190_v5 = vld [vmem:[#allocation13 + $0x18] sm:$0xff]  ;;  %v192_v6 = vld [vmem:[#allocation13 + $0x28] sm:$0xff]  ;;  %v187_v7 = vld [vmem:[#allocation13] sm:$0xff]  ;;  %vm201_vm0 = vcmask 130048   ;;  %s1874_s19 = smov (!%p1407_p4), %s2284_s0  }
  0x39   :  { %1535 = vmatpush.msra.mxu3 %v190_v5  ;;  %322 = vmatpush.msra.mxu2 %v192_v6  ;;  %v189_v8 = vld [vmem:[#allocation13 + $0x10] sm:$0xff]  ;;  %v191_v10 = vld [vmem:[#allocation13 + $0x20] sm:$0xff]  ;;  %v188_v12 = vld [vmem:[#allocation13 + $0x8] sm:$0xff] }
  0x3a   :  { %v185_v9 = vld [vmem:[#allocation8 + $0x30] sm:$0xff]  ;;  %v179_v11 = vld [vmem:[#allocation8] sm:$0xff]  ;;  %240 = vmatpush.msra.mxu0 %v190_v5  ;;  %281 = vmatpush.msra.mxu1 %v191_v10  ;;  %v186_v13 = vld [vmem:[#allocation8 + $0x38] sm:$0xff] }
  0x3b   :  { %1536 = vmatpush.msra.mxu3 %v187_v7  ;;  %323 = vmatpush.msra.mxu2 %v189_v8  ;;  %v180_v14 = vld [vmem:[#allocation8 + $0x8] sm:$0xff]  ;;  %v181_v15 = vld [vmem:[#allocation8 + $0x10] sm:$0xff]  ;;  %v182_v16 = vld [vmem:[#allocation8 + $0x18] sm:$0xff] }
  0x3c   :  { %1461 = vmatmul.msk.f32.vlgmr.msra.gmra.mxu3 %vm201_vm0, %v185_v9  ;;  %1471 = vmatmul.msk.f32.vlgmr.msra.gmra.mxu2 %vm201_vm0, %v179_v11  ;;  %v183_v17 = vld [vmem:[#allocation8 + $0x20] sm:$0xff]  ;;  %v184_v18 = vld [vmem:[#allocation8 + $0x28] sm:$0xff]  ;;  %v193_v19 = vld [vmem:[%s2267_s8] ss:$2 sm:$0x7] }
  0x3d   :  { %1537 = vmatpush.msrb.mxu3 %v191_v10  ;;  %241 = vmatpush.msra.mxu0 %v187_v7  ;;  %v2063_v20 = vperm.slane %v193_v19, 0  ;;  %v2065_v21 = vperm.slane %v193_v19, 1  ;;  %v2068_v25 = vperm.slane %v193_v19, 2 }
  0x3e   :  { %282 = vmatpush.msra.mxu1 %v188_v12  ;;  %1455 = vmatmul.msk.f32.vlgmr.msra.gmra.mxu0 %vm201_vm0, %v179_v11 }
  0x3f   :  { %1463 = vmatmul.msk.f32.vlgmr.msra.gmra.mxu1 %vm201_vm0, %v179_v11  ;;  %1538 = vmatpush.msrb.mxu3 %v188_v12 }
  0x41   :  { %1539 = vmatpush.msra.mxu3 %v192_v6 }
  0x43   :  { %1540 = vmatpush.msra.mxu3 %v189_v8 }
  0x44   :  { %1462 = vmatmul.msk.f32.gmra.mxu3 %vm201_vm0, %v186_v13  ;;  %1472 = vmatmul.msk.f32.gmra.mxu2 %vm201_vm0, %v180_v14 }
  0x46   :  { %1456 = vmatmul.msk.f32.gmra.mxu0 %vm201_vm0, %v180_v14 }
  0x47   :  { %1464 = vmatmul.msk.f32.gmra.mxu1 %vm201_vm0, %v180_v14 }
  0x4c   :  { %1469 = vmatmul.msk.f32.vlgmr.msrb.gmra.mxu3 %vm201_vm0, %v185_v9  ;;  %1473 = vmatmul.msk.f32.gmra.mxu2 %vm201_vm0, %v181_v15 }
  0x4e   :  { %1457 = vmatmul.msk.f32.gmra.mxu0 %vm201_vm0, %v181_v15 }
  0x4f   :  { %1465 = vmatmul.msk.f32.gmra.mxu1 %vm201_vm0, %v181_v15 }
  0x54   :  { %1470 = vmatmul.msk.f32.gmra.mxu3 %vm201_vm0, %v186_v13  ;;  %1474 = vmatmul.msk.f32.gmra.mxu2 %vm201_vm0, %v182_v16 }
  0x56   :  { %1458 = vmatmul.msk.f32.gmra.mxu0 %vm201_vm0, %v182_v16 }
  0x57   :  { %1466 = vmatmul.msk.f32.gmra.mxu1 %vm201_vm0, %v182_v16 }
  0x5c   :  { %1475 = vmatmul.msk.f32.gmra.mxu2 %vm201_vm0, %v183_v17  ;;  %1477 = vmatmul.msk.f32.vlgmr.msra.gmra.mxu3 %vm201_vm0, %v185_v9 }
  0x5e   :  { %1459 = vmatmul.msk.f32.gmra.mxu0 %vm201_vm0, %v183_v17 }
  0x5f   :  { %1467 = vmatmul.msk.f32.gmra.mxu1 %vm201_vm0, %v183_v17 }
  0x64   :  { %1476 = vmatmul.msk.f32.gmra.mxu2 %vm201_vm0, %v184_v18  ;;  %1478 = vmatmul.msk.f32.gmra.mxu3 %vm201_vm0, %v186_v13 }
  0x66   :  { %1460 = vmatmul.msk.f32.gmra.mxu0 %vm201_vm0, %v184_v18 }
  0x67   :  { %1468 = vmatmul.msk.f32.gmra.mxu1 %vm201_vm0, %v184_v18 }
  0xbb   :  { %v243_v22 = vpop.f32.mrf.mxu0 }
  0xbc   :  { %v244_v23 = vadd.f32 %v243_v22, %v2063_v20  ;;  %v284_v24 = vpop.f32.mrf.mxu1 }
  0xbd   :  { %v285_v26 = vadd.f32 %v284_v24, %v2065_v21 }
  0xbe   :  { %349 = vst [vmem:[#allocation2] sm:$0xff] %v244_v23 }
  0xbf   :  { %v261_v27 = vpop.f32.mrf.mxu3  ;;  %350 = vst [vmem:[#allocation2 + $0x8] sm:$0xff] %v285_v26  ;;  %v325_v28 = vpop.f32.mrf.mxu2 }
  0xc0   :  { %v262_v29 = vadd.f32 %v261_v27, %v2063_v20  ;;  %v326_v30 = vadd.f32 %v325_v28, %v2068_v25 }
  0xc2   :  { %367 = vst [vmem:[#allocation2 + $0x90] sm:$0xff] %v262_v29 }
  0xc3   :  { %351 = vst [vmem:[#allocation2 + $0x10] sm:$0xff] %v326_v30  ;;  %v246_v31 = vpop.f32.mrf.mxu0 }
  0xc4   :  { %v247_v32 = vadd.f32 %v246_v31, %v2063_v20  ;;  %v287_v33 = vpop.f32.mrf.mxu1 }
  0xc5   :  { %v288_v34 = vadd.f32 %v287_v33, %v2065_v21 }
  0xc6   :  { %352 = vst [vmem:[#allocation2 + $0x18] sm:$0xff] %v247_v32 }
  0xc7   :  { %v264_v35 = vpop.f32.mrf.mxu3  ;;  %353 = vst [vmem:[#allocation2 + $0x20] sm:$0xff] %v288_v34  ;;  %v328_v36 = vpop.f32.mrf.mxu2 }
  0xc8   :  { %v265_v37 = vadd.f32 %v264_v35, %v2063_v20  ;;  %v329_v38 = vadd.f32 %v328_v36, %v2068_v25 }
  0xca   :  { %370 = vst [vmem:[#allocation2 + $0xa8] sm:$0xff] %v265_v37 }
  0xcb   :  { %354 = vst [vmem:[#allocation2 + $0x28] sm:$0xff] %v329_v38  ;;  %v249_v39 = vpop.f32.mrf.mxu0 }
  0xcc   :  { %v250_v40 = vadd.f32 %v249_v39, %v2063_v20  ;;  %v290_v41 = vpop.f32.mrf.mxu1 }
  0xcd   :  { %v291_v42 = vadd.f32 %v290_v41, %v2065_v21 }
  0xce   :  { %355 = vst [vmem:[#allocation2 + $0x30] sm:$0xff] %v250_v40 }
  0xcf   :  { %356 = vst [vmem:[#allocation2 + $0x38] sm:$0xff] %v291_v42  ;;  %v302_v43 = vpop.f32.mrf.mxu3  ;;  %v331_v44 = vpop.f32.mrf.mxu2 }
  0xd0   :  { %v303_v45 = vadd.f32 %v302_v43, %v2065_v21  ;;  %v332_v46 = vadd.f32 %v331_v44, %v2068_v25 }
  0xd2   :  { %368 = vst [vmem:[#allocation2 + $0x98] sm:$0xff] %v303_v45 }
  0xd3   :  { %357 = vst [vmem:[#allocation2 + $0x40] sm:$0xff] %v332_v46  ;;  %v252_v47 = vpop.f32.mrf.mxu0 }
  0xd4   :  { %v253_v48 = vadd.f32 %v252_v47, %v2063_v20  ;;  %v293_v49 = vpop.f32.mrf.mxu1 }
  0xd5   :  { %v294_v50 = vadd.f32 %v293_v49, %v2065_v21 }
  0xd6   :  { %358 = vst [vmem:[#allocation2 + $0x48] sm:$0xff] %v253_v48 }
  0xd7   :  { %359 = vst [vmem:[#allocation2 + $0x50] sm:$0xff] %v294_v50  ;;  %v305_v51 = vpop.f32.mrf.mxu3  ;;  %v334_v52 = vpop.f32.mrf.mxu2 }
  0xd8   :  { %v306_v53 = vadd.f32 %v305_v51, %v2065_v21  ;;  %v335_v54 = vadd.f32 %v334_v52, %v2068_v25 }
  0xda   :  { %371 = vst [vmem:[#allocation2 + $0xb0] sm:$0xff] %v306_v53 }
  0xdb   :  { %360 = vst [vmem:[#allocation2 + $0x58] sm:$0xff] %v335_v54  ;;  %v255_v55 = vpop.f32.mrf.mxu0 }
  0xdc   :  { %v256_v56 = vadd.f32 %v255_v55, %v2063_v20  ;;  %v296_v57 = vpop.f32.mrf.mxu1 }
  0xdd   :  { %v297_v58 = vadd.f32 %v296_v57, %v2065_v21 }
  0xde   :  { %361 = vst [vmem:[#allocation2 + $0x60] sm:$0xff] %v256_v56 }
  0xdf   :  { %362 = vst [vmem:[#allocation2 + $0x68] sm:$0xff] %v297_v58  ;;  %v337_v59 = vpop.f32.mrf.mxu2  ;;  %v343_v60 = vpop.f32.mrf.mxu3 }
  0xe0   :  { %v338_v61 = vadd.f32 %v337_v59, %v2068_v25  ;;  %v344_v62 = vadd.f32 %v343_v60, %v2068_v25 }
  0xe2   :  { %363 = vst [vmem:[#allocation2 + $0x70] sm:$0xff] %v338_v61 }
  0xe3   :  { %369 = vst [vmem:[#allocation2 + $0xa0] sm:$0xff] %v344_v62  ;;  %v258_v63 = vpop.f32.mrf.mxu0 }
  0xe4   :  { %v259_v0 = vadd.f32 %v258_v63, %v2063_v20  ;;  %v299_v4 = vpop.f32.mrf.mxu1 }
  0xe5   :  { %v300_v5 = vadd.f32 %v299_v4, %v2065_v21 }
  0xe6   :  { %364 = vst [vmem:[#allocation2 + $0x78] sm:$0xff] %v259_v0 }
  0xe7   :  { %365 = vst [vmem:[#allocation2 + $0x80] sm:$0xff] %v300_v5  ;;  %v340_v6 = vpop.f32.mrf.mxu2  ;;  %v346_v7 = vpop.f32.mrf.mxu3  ;;  %1408 = sbr.rel (%p1407_p4) target bundleno = 244 (0xf4), region = 150 }
  0xe8   :  { %v341_v8 = vadd.f32 %v340_v6, %v2068_v25  ;;  %v347_v9 = vadd.f32 %v346_v7, %v2068_v25 }
  0xea   :  { %366 = vst [vmem:[#allocation2 + $0x88] sm:$0xff] %v341_v8 }
  0xeb   :  { %372 = vst [vmem:[#allocation2 + $0xb8] sm:$0xff] %v347_v9 }
  0xec LB: > { %s1479_s1 = sshll.u32 %s1876_s19, 3  ;;  %v1914_v10 = vmov 0.0   ;;  %s376_s19 = sadd.s32 1, %s1876_s19   ;;  %s1876_s19 = sphi %s1874_s19, %s376_s19  }
  0xed   : > { %s380_s20 = scalar_lea.vmem [#allocation19], %s1479_s1  ;;  %p375_p5 = scmp.ge.s32.totalorder %s376_s19, 8 }
  0xee   : > { %381 = vst [vmem:[%s380_s20] sm:$0xff] %v1914_v10 }
  0xef   :  { %378 = sbr.rel (!%p375_p5) target bundleno = 236 (0xec), region = 156 }
  0xf4 PF:  { %385 = sbr.rel (%p1453_p2) target bundleno = 258 (0x102), region = 84 }
  0xf9   :  { %v1915_v11 = vmov 0.0  }
  0xfa   :  { %386 = vst [vmem:[#allocation20] sm:$0xff] %v1915_v11 }
  0xfb   :  { %387 = vst [vmem:[#allocation20 + $0x8] sm:$0xff] %v1915_v11 }
  0xfc   :  { %388 = vst [vmem:[#allocation20 + $0x10] sm:$0xff] %v1915_v11 }
  0xfd   :  { %389 = vst [vmem:[#allocation20 + $0x18] sm:$0xff] %v1915_v11 }
  0xfe   :  { %390 = vst [vmem:[#allocation20 + $0x20] sm:$0xff] %v1915_v11 }
  0xff   :  { %391 = vst [vmem:[#allocation20 + $0x28] sm:$0xff] %v1915_v11 }
 0x100   :  { %392 = vst [vmem:[#allocation20 + $0x30] sm:$0xff] %v1915_v11 }
 0x101   :  { %393 = vst [vmem:[#allocation20 + $0x38] sm:$0xff] %v1915_v11 }
 0x102 PF:  { %397 = sbr.rel (%p1454_p3) target bundleno = 452 (0x1c4), region = 88  ;;  %p1412_p6 = scmp.ge.s32.totalorder (!%p1454_p3), %s2284_s0, 8 }
 0x107   :  { %v409_v12 = vld [vmem:[#allocation14 + $0x18] sm:$0xff]  ;;  %v411_v13 = vld [vmem:[#allocation14 + $0x28] sm:$0xff]  ;;  %v406_v14 = vld [vmem:[#allocation14] sm:$0xff]  ;;  %vm421_vm1 = vcmask 130048  }
 0x108   :  { %1541 = vmatpush.msra.mxu3 %v409_v12  ;;  %542 = vmatpush.msra.mxu2 %v411_v13  ;;  %v408_v15 = vld [vmem:[#allocation14 + $0x10] sm:$0xff]  ;;  %v404_v16 = vld [vmem:[#allocation11 + $0x30] sm:$0xff]  ;;  %v407_v19 = vld [vmem:[#allocation14 + $0x8] sm:$0xff] }
 0x109   :  { %v410_v17 = vld [vmem:[#allocation14 + $0x20] sm:$0xff]  ;;  %v398_v18 = vld [vmem:[#allocation11] sm:$0xff]  ;;  %460 = vmatpush.msra.mxu0 %v409_v12  ;;  %v405_v20 = vld [vmem:[#allocation11 + $0x38] sm:$0xff] }
 0x10a   :  { %501 = vmatpush.msra.mxu1 %v410_v17  ;;  %1542 = vmatpush.msra.mxu3 %v406_v14  ;;  %v399_v21 = vld [vmem:[#allocation11 + $0x8] sm:$0xff]  ;;  %v400_v22 = vld [vmem:[#allocation11 + $0x10] sm:$0xff]  ;;  %v401_v23 = vld [vmem:[#allocation11 + $0x18] sm:$0xff] }
 0x10b   :  { %543 = vmatpush.msra.mxu2 %v408_v15  ;;  %1489 = vmatmul.msk.f32.vlgmr.msra.gmra.mxu3 %vm421_vm1, %v404_v16  ;;  %v402_v24 = vld [vmem:[#allocation11 + $0x20] sm:$0xff]  ;;  %v403_v25 = vld [vmem:[#allocation11 + $0x28] sm:$0xff]  ;;  %v1482_v26 = vld [vmem:[%s2267_s8 + $0x1] ss:$2 sm:$0x7]  ;;  %s1878_s8 = smov (!%p1412_p6), %s2284_s0  }
 0x10c   :  { %1499 = vmatmul.msk.f32.vlgmr.msra.gmra.mxu2 %vm421_vm1, %v398_v18  ;;  %1543 = vmatpush.msrb.mxu3 %v410_v17  ;;  %v2126_v27 = vperm.slane %v1482_v26, 0  ;;  %v2128_v28 = vperm.slane %v1482_v26, 1  ;;  %v2131_v32 = vperm.slane %v1482_v26, 2 }
 0x10d   :  { %461 = vmatpush.msra.mxu0 %v406_v14  ;;  %502 = vmatpush.msra.mxu1 %v407_v19 }
 0x10e   :  { %1483 = vmatmul.msk.f32.vlgmr.msra.gmra.mxu0 %vm421_vm1, %v398_v18  ;;  %1491 = vmatmul.msk.f32.vlgmr.msra.gmra.mxu1 %vm421_vm1, %v398_v18 }
 0x10f   :  { %1544 = vmatpush.msrb.mxu3 %v407_v19 }
 0x111   :  { %1545 = vmatpush.msra.mxu3 %v411_v13 }
 0x113   :  { %1546 = vmatpush.msra.mxu3 %v408_v15 }
 0x114   :  { %1490 = vmatmul.msk.f32.gmra.mxu3 %vm421_vm1, %v405_v20  ;;  %1500 = vmatmul.msk.f32.gmra.mxu2 %vm421_vm1, %v399_v21 }
 0x116   :  { %1484 = vmatmul.msk.f32.gmra.mxu0 %vm421_vm1, %v399_v21  ;;  %1492 = vmatmul.msk.f32.gmra.mxu1 %vm421_vm1, %v399_v21 }
 0x11c   :  { %1497 = vmatmul.msk.f32.vlgmr.msrb.gmra.mxu3 %vm421_vm1, %v404_v16  ;;  %1501 = vmatmul.msk.f32.gmra.mxu2 %vm421_vm1, %v400_v22 }
 0x11e   :  { %1485 = vmatmul.msk.f32.gmra.mxu0 %vm421_vm1, %v400_v22  ;;  %1493 = vmatmul.msk.f32.gmra.mxu1 %vm421_vm1, %v400_v22 }
 0x124   :  { %1498 = vmatmul.msk.f32.gmra.mxu3 %vm421_vm1, %v405_v20  ;;  %1502 = vmatmul.msk.f32.gmra.mxu2 %vm421_vm1, %v401_v23 }
 0x126   :  { %1486 = vmatmul.msk.f32.gmra.mxu0 %vm421_vm1, %v401_v23  ;;  %1494 = vmatmul.msk.f32.gmra.mxu1 %vm421_vm1, %v401_v23 }
 0x12c   :  { %1503 = vmatmul.msk.f32.gmra.mxu2 %vm421_vm1, %v402_v24  ;;  %1505 = vmatmul.msk.f32.vlgmr.msra.gmra.mxu3 %vm421_vm1, %v404_v16 }
 0x12e   :  { %1487 = vmatmul.msk.f32.gmra.mxu0 %vm421_vm1, %v402_v24  ;;  %1495 = vmatmul.msk.f32.gmra.mxu1 %vm421_vm1, %v402_v24 }
 0x134   :  { %1504 = vmatmul.msk.f32.gmra.mxu2 %vm421_vm1, %v403_v25  ;;  %1506 = vmatmul.msk.f32.gmra.mxu3 %vm421_vm1, %v405_v20 }
 0x136   :  { %1488 = vmatmul.msk.f32.gmra.mxu0 %vm421_vm1, %v403_v25  ;;  %1496 = vmatmul.msk.f32.gmra.mxu1 %vm421_vm1, %v403_v25 }
 0x18b   :  { %v463_v29 = vpop.f32.mrf.mxu0  ;;  %v504_v31 = vpop.f32.mrf.mxu1 }
 0x18c   :  { %v464_v30 = vadd.f32 %v463_v29, %v2126_v27  ;;  %v505_v33 = vadd.f32 %v504_v31, %v2128_v28 }
 0x18e   :  { %569 = vst [vmem:[#allocation3] sm:$0xff] %v464_v30  ;;  %v481_v34 = vpop.f32.mrf.mxu3 }
 0x18f   :  { %570 = vst [vmem:[#allocation3 + $0x8] sm:$0xff] %v505_v33  ;;  %v545_v35 = vpop.f32.mrf.mxu2  ;;  %v482_v36 = vadd.f32 %v481_v34, %v2126_v27 }
 0x190   :  { %v546_v37 = vadd.f32 %v545_v35, %v2131_v32 }
 0x191   :  { %587 = vst [vmem:[#allocation3 + $0x90] sm:$0xff] %v482_v36 }
 0x192   :  { %571 = vst [vmem:[#allocation3 + $0x10] sm:$0xff] %v546_v37 }
 0x193   :  { %v466_v38 = vpop.f32.mrf.mxu0  ;;  %v507_v40 = vpop.f32.mrf.mxu1 }
 0x194   :  { %v467_v39 = vadd.f32 %v466_v38, %v2126_v27  ;;  %v508_v41 = vadd.f32 %v507_v40, %v2128_v28 }
 0x196   :  { %572 = vst [vmem:[#allocation3 + $0x18] sm:$0xff] %v467_v39 }
 0x197   :  { %v484_v42 = vpop.f32.mrf.mxu3  ;;  %573 = vst [vmem:[#allocation3 + $0x20] sm:$0xff] %v508_v41  ;;  %v548_v43 = vpop.f32.mrf.mxu2 }
 0x198   :  { %v485_v44 = vadd.f32 %v484_v42, %v2126_v27  ;;  %v549_v45 = vadd.f32 %v548_v43, %v2131_v32 }
 0x19a   :  { %590 = vst [vmem:[#allocation3 + $0xa8] sm:$0xff] %v485_v44 }
 0x19b   :  { %574 = vst [vmem:[#allocation3 + $0x28] sm:$0xff] %v549_v45  ;;  %v469_v46 = vpop.f32.mrf.mxu0  ;;  %v510_v48 = vpop.f32.mrf.mxu1 }
 0x19c   :  { %v470_v47 = vadd.f32 %v469_v46, %v2126_v27  ;;  %v511_v49 = vadd.f32 %v510_v48, %v2128_v28 }
 0x19e   :  { %575 = vst [vmem:[#allocation3 + $0x30] sm:$0xff] %v470_v47 }
 0x19f   :  { %576 = vst [vmem:[#allocation3 + $0x38] sm:$0xff] %v511_v49  ;;  %v522_v50 = vpop.f32.mrf.mxu3  ;;  %v551_v51 = vpop.f32.mrf.mxu2 }
 0x1a0   :  { %v523_v52 = vadd.f32 %v522_v50, %v2128_v28  ;;  %v552_v53 = vadd.f32 %v551_v51, %v2131_v32 }
 0x1a2   :  { %588 = vst [vmem:[#allocation3 + $0x98] sm:$0xff] %v523_v52 }
 0x1a3   :  { %577 = vst [vmem:[#allocation3 + $0x40] sm:$0xff] %v552_v53  ;;  %v472_v54 = vpop.f32.mrf.mxu0  ;;  %v513_v56 = vpop.f32.mrf.mxu1 }
 0x1a4   :  { %v473_v55 = vadd.f32 %v472_v54, %v2126_v27  ;;  %v514_v57 = vadd.f32 %v513_v56, %v2128_v28 }
 0x1a6   :  { %578 = vst [vmem:[#allocation3 + $0x48] sm:$0xff] %v473_v55 }
 0x1a7   :  { %579 = vst [vmem:[#allocation3 + $0x50] sm:$0xff] %v514_v57  ;;  %v525_v58 = vpop.f32.mrf.mxu3  ;;  %v554_v59 = vpop.f32.mrf.mxu2 }
 0x1a8   :  { %v526_v60 = vadd.f32 %v525_v58, %v2128_v28  ;;  %v555_v61 = vadd.f32 %v554_v59, %v2131_v32 }
 0x1aa   :  { %591 = vst [vmem:[#allocation3 + $0xb0] sm:$0xff] %v526_v60 }
 0x1ab   :  { %580 = vst [vmem:[#allocation3 + $0x58] sm:$0xff] %v555_v61  ;;  %v475_v62 = vpop.f32.mrf.mxu0  ;;  %v516_v0 = vpop.f32.mrf.mxu1 }
 0x1ac   :  { %v476_v63 = vadd.f32 %v475_v62, %v2126_v27  ;;  %v517_v4 = vadd.f32 %v516_v0, %v2128_v28 }
 0x1ae   :  { %581 = vst [vmem:[#allocation3 + $0x60] sm:$0xff] %v476_v63 }
 0x1af   :  { %582 = vst [vmem:[#allocation3 + $0x68] sm:$0xff] %v517_v4  ;;  %v557_v5 = vpop.f32.mrf.mxu2  ;;  %v563_v6 = vpop.f32.mrf.mxu3 }
 0x1b0   :  { %v558_v7 = vadd.f32 %v557_v5, %v2131_v32  ;;  %v564_v8 = vadd.f32 %v563_v6, %v2131_v32 }
 0x1b2   :  { %583 = vst [vmem:[#allocation3 + $0x70] sm:$0xff] %v558_v7 }
 0x1b3   :  { %589 = vst [vmem:[#allocation3 + $0xa0] sm:$0xff] %v564_v8  ;;  %v478_v9 = vpop.f32.mrf.mxu0  ;;  %v519_v11 = vpop.f32.mrf.mxu1 }
 0x1b4   :  { %v479_v10 = vadd.f32 %v478_v9, %v2126_v27  ;;  %v520_v12 = vadd.f32 %v519_v11, %v2128_v28 }
 0x1b6   :  { %584 = vst [vmem:[#allocation3 + $0x78] sm:$0xff] %v479_v10 }
 0x1b7   :  { %585 = vst [vmem:[#allocation3 + $0x80] sm:$0xff] %v520_v12  ;;  %v560_v13 = vpop.f32.mrf.mxu2  ;;  %v566_v14 = vpop.f32.mrf.mxu3  ;;  %1413 = sbr.rel (%p1412_p6) target bundleno = 452 (0x1c4), region = 161 }
 0x1b8   :  { %v561_v15 = vadd.f32 %v560_v13, %v2131_v32  ;;  %v567_v16 = vadd.f32 %v566_v14, %v2131_v32 }
 0x1ba   :  { %586 = vst [vmem:[#allocation3 + $0x88] sm:$0xff] %v561_v15 }
 0x1bb   :  { %592 = vst [vmem:[#allocation3 + $0xb8] sm:$0xff] %v567_v16 }
 0x1bc LB: > { %s1507_s25 = sshll.u32 %s1880_s8, 3  ;;  %v1916_v17 = vmov 0.0   ;;  %s596_s8 = sadd.s32 1, %s1880_s8   ;;  %s1880_s8 = sphi %s1878_s8, %s596_s8  }
 0x1bd   : > { %s600_s4 = scalar_lea.vmem [#allocation20], %s1507_s25  ;;  %p595_p7 = scmp.ge.s32.totalorder %s596_s8, 8 }
 0x1be   : > { %601 = vst [vmem:[%s600_s4] sm:$0xff] %v1916_v17 }
 0x1bf   :  { %598 = sbr.rel (!%p595_p7) target bundleno = 444 (0x1bc), region = 167 }
 0x1c4 PF:  { %v604_v18 = vld [vmem:[#allocation4] sm:$0xff]   ;;  %v605_v19 = vld [vmem:[#allocation5] sm:$0xff]   ;;  %1420 = sbr.rel (%p1454_p3) target bundleno = 685 (0x2ad), region = 172  ;;  %s2168_s26 = smov (!%p1454_p3), 0  }
 0x1c5   :  { %v2271_v20 = vmov %v605_v19  ;;  %v2272_v21 = vmov %v604_v18 }
 0x1c9 LB: > { %v665_v22 = vld [vmem:[#allocation16 + $0x168] sm:$0xff]  ;;  %v662_v23 = vld [vmem:[#allocation16 + $0x150] sm:$0xff]  ;;  %v659_v26 = vld [vmem:[#allocation16 + $0x138] sm:$0xff]  ;;  %s1513_s27 = sadd.s32 4294967295, %s2284_s0  ;;  %s1531_s29 = smul.u32 24, %s1892_s26  ;;  %s1892_s26 = sphi %s2168_s26, %s609_s26   ;;  %v1888_v18 = vphi %v604_v18, %v2278_v18   ;;  %v1884_v19 = vphi %v605_v19, %v2277_v19  }
 0x1ca   : > { %v843_v24 = vld [vmem:[#allocation17 + $0x168] sm:$0xff]  ;;  %668 = vmatpush.msra.mxu0 %v665_v22  ;;  %v840_v25 = vld [vmem:[#allocation17 + $0x150] sm:$0xff]  ;;  %v837_v28 = vld [vmem:[#allocation17 + $0x138] sm:$0xff]  ;;  %s2186_s28 = ssub.s32 %s1513_s27, %s1892_s26  ;;  %s1512_s2 = sshll.u32 %s1892_s26, 3 }
 0x1cb   : > { %846 = vmatpush.msra.mxu3 %v843_v24  ;;  %v666_v27 = vld [vmem:[#allocation16 + $0x170] sm:$0xff]  ;;  %v663_v29 = vld [vmem:[#allocation16 + $0x158] sm:$0xff]  ;;  %v656_v30 = vld [vmem:[#allocation16 + $0x120] sm:$0xff]  ;;  %s1532_s6 = smul.u32 24, %s2186_s28  ;;  %s2195_s30 = scalar_lea.vmem [#allocation2], %s1531_s29 }
 0x1cc   : > { %669 = vmatpush.msra.mxu0 %v662_v23  ;;  %688 = vmatpush.msra.mxu1 %v666_v27  ;;  %v834_v31 = vld [vmem:[#allocation17 + $0x120] sm:$0xff]  ;;  %v653_v33 = vld [vmem:[#allocation16 + $0x108] sm:$0xff]  ;;  %v650_v36 = vld [vmem:[#allocation16 + $0xf0] sm:$0xff]  ;;  %v778_v27 = vstv %s1892_s26  ;;  %s787_s14 = scalar_lea.vmem [#allocation19], %s1512_s2  ;;  %s1517_s12 = sshll.u32 %s2186_s28, 3 }
 0x1cd   : > { %847 = vmatpush.msra.mxu3 %v840_v25  ;;  %v660_v32 = vld [vmem:[#allocation16 + $0x140] sm:$0xff]  ;;  %v831_v34 = vld [vmem:[#allocation17 + $0x108] sm:$0xff]  ;;  %v828_v37 = vld [vmem:[#allocation17 + $0xf0] sm:$0xff]  ;;  %vm779_vm2 = vcmp.lt.s32.totalorder %v778_v27, %v2018_v1  ;;  %s2199_s7 = scalar_lea.vmem [#allocation3], %s1532_s6  ;;  %s965_s13 = scalar_lea.vmem [#allocation20], %s1517_s12 }
 0x1ce   : > { %670 = vmatpush.msra.mxu0 %v659_v26  ;;  %689 = vmatpush.msra.mxu1 %v663_v29  ;;  %v657_v35 = vld [vmem:[#allocation16 + $0x128] sm:$0xff]  ;;  %v654_v38 = vld [vmem:[#allocation16 + $0x110] sm:$0xff]  ;;  %v647_v39 = vld [vmem:[#allocation16 + $0xd8] sm:$0xff]  ;;  %s609_s26 = sadd.s32 1, %s1892_s26  }
 0x1cf   : > { %848 = vmatpush.msra.mxu3 %v837_v28  ;;  %v825_v40 = vld [vmem:[#allocation17 + $0xd8] sm:$0xff]  ;;  %v644_v42 = vld [vmem:[#allocation16 + $0xc0] sm:$0xff]  ;;  %v641_v46 = vld [vmem:[#allocation16 + $0xa8] sm:$0xff]  ;;  %p608_p8 = scmp.ge.s32.totalorder %s609_s26, %s2284_s0 }
 0x1d0   : > { %671 = vmatpush.msra.mxu0 %v656_v30  ;;  %690 = vmatpush.msra.mxu1 %v660_v32  ;;  %v651_v41 = vld [vmem:[#allocation16 + $0xf8] sm:$0xff]  ;;  %v822_v43 = vld [vmem:[#allocation17 + $0xc0] sm:$0xff]  ;;  %v819_v47 = vld [vmem:[#allocation17 + $0xa8] sm:$0xff]  ;;  %v1917_v32 = vmov 0  }
 0x1d1   : > { %849 = vmatpush.msra.mxu3 %v834_v31  ;;  %v648_v44 = vld [vmem:[#allocation16 + $0xe0] sm:$0xff]  ;;  %v667_v45 = vld [vmem:[#allocation16 + $0x178] sm:$0xff]  ;;  %v645_v49 = vld [vmem:[#allocation16 + $0xc8] sm:$0xff]  ;;  %1621 = vset.pattern.permute.xlu0 %v1917_v32 }
 0x1d2   : > { %672 = vmatpush.msra.mxu0 %v653_v33  ;;  %691 = vmatpush.msra.mxu1 %v657_v35  ;;  %v664_v48 = vld [vmem:[#allocation16 + $0x160] sm:$0xff]  ;;  %v638_v50 = vld [vmem:[#allocation16 + $0x90] sm:$0xff]  ;;  %v661_v52 = vld [vmem:[#allocation16 + $0x148] sm:$0xff]  ;;  %v780_v33 = vsel %vm779_vm2, 1, %v1917_v32 }
 0x1d3   : > { %850 = vmatpush.msra.mxu3 %v831_v34  ;;  %708 = vmatpush.msra.mxu2 %v667_v45  ;;  %v816_v51 = vld [vmem:[#allocation17 + $0x90] sm:$0xff]  ;;  %v635_v55 = vld [vmem:[#allocation16 + $0x78] sm:$0xff]  ;;  %v632_v59 = vld [vmem:[#allocation16 + $0x60] sm:$0xff] }
 0x1d4   : > { %673 = vmatpush.msra.mxu0 %v650_v36  ;;  %692 = vmatpush.msra.mxu1 %v654_v38  ;;  %v642_v53 = vld [vmem:[#allocation16 + $0xb0] sm:$0xff]  ;;  %v813_v56 = vld [vmem:[#allocation17 + $0x78] sm:$0xff]  ;;  %v810_v60 = vld [vmem:[#allocation17 + $0x60] sm:$0xff] }
 0x1d5   : > { %851 = vmatpush.msra.mxu3 %v828_v37  ;;  %709 = vmatpush.msra.mxu2 %v664_v48  ;;  %v658_v54 = vld [vmem:[#allocation16 + $0x130] sm:$0xff]  ;;  %v639_v57 = vld [vmem:[#allocation16 + $0x98] sm:$0xff]  ;;  %v636_v61 = vld [vmem:[#allocation16 + $0x80] sm:$0xff] }
 0x1d6   : > { %674 = vmatpush.msra.mxu0 %v647_v39  ;;  %693 = vmatpush.msra.mxu1 %v651_v41  ;;  %v655_v58 = vld [vmem:[#allocation16 + $0x118] sm:$0xff]  ;;  %v652_v62 = vld [vmem:[#allocation16 + $0x100] sm:$0xff]  ;;  %v629_v63 = vld [vmem:[#allocation16 + $0x48] sm:$0xff]  ;;  %v956_v39 = vstv %s2186_s28 }
 0x1d7   : > { %852 = vmatpush.msra.mxu3 %v825_v40  ;;  %710 = vmatpush.msra.mxu2 %v661_v52  ;;  %v807_v0 = vld [vmem:[#allocation17 + $0x48] sm:$0xff]  ;;  %v626_v6 = vld [vmem:[#allocation16 + $0x30] sm:$0xff]  ;;  %v623_v10 = vld [vmem:[#allocation16 + $0x18] sm:$0xff]  ;;  %vm957_vm3 = vcmp.lt.s32.totalorder %v956_v39, %v2018_v1 }
 0x1d8   : > { %675 = vmatpush.msra.mxu0 %v644_v42  ;;  %694 = vmatpush.msra.mxu1 %v648_v44  ;;  %v633_v4 = vld [vmem:[#allocation16 + $0x68] sm:$0xff]  ;;  %v804_v7 = vld [vmem:[#allocation17 + $0x30] sm:$0xff]  ;;  %v801_v11 = vld [vmem:[#allocation17 + $0x18] sm:$0xff]  ;;  %v958_v48 = vsel %vm957_vm3, 1, %v1917_v32 }
 0x1d9   : > { %853 = vmatpush.msra.mxu3 %v822_v43  ;;  %711 = vmatpush.msra.mxu2 %v658_v54  ;;  %v649_v5 = vld [vmem:[#allocation16 + $0xe8] sm:$0xff]  ;;  %v630_v8 = vld [vmem:[#allocation16 + $0x50] sm:$0xff]  ;;  %v627_v12 = vld [vmem:[#allocation16 + $0x38] sm:$0xff] }
 0x1da   : > { %676 = vmatpush.msra.mxu0 %v641_v46  ;;  %695 = vmatpush.msra.mxu1 %v645_v49  ;;  %v646_v9 = vld [vmem:[#allocation16 + $0xd0] sm:$0xff]  ;;  %v643_v13 = vld [vmem:[#allocation16 + $0xb8] sm:$0xff]  ;;  %v620_v14 = vld [vmem:[#allocation16] sm:$0xff] }
 0x1db   : > { %854 = vmatpush.msra.mxu3 %v819_v47  ;;  %712 = vmatpush.msra.mxu2 %v655_v58  ;;  %v798_v15 = vld [vmem:[#allocation17] sm:$0xff]  ;;  %v844_v16 = vld [vmem:[#allocation17 + $0x170] sm:$0xff]  ;;  %v841_v20 = vld [vmem:[#allocation17 + $0x158] sm:$0xff] }
 0x1dc   : > { %677 = vmatpush.msra.mxu0 %v638_v50  ;;  %696 = vmatpush.msra.mxu1 %v642_v53  ;;  %v624_v17 = vld [vmem:[#allocation16 + $0x20] sm:$0xff]  ;;  %v621_v21 = vld [vmem:[#allocation16 + $0x8] sm:$0xff]  ;;  %v845_v22 = vld [vmem:[#allocation17 + $0x178] sm:$0xff] }
 0x1dd   : > { %855 = vmatpush.msra.mxu3 %v816_v51  ;;  %713 = vmatpush.msra.mxu2 %v652_v62  ;;  %v640_v23 = vld [vmem:[#allocation16 + $0xa0] sm:$0xff]  ;;  %v637_v26 = vld [vmem:[#allocation16 + $0x88] sm:$0xff]  ;;  %v634_v30 = vld [vmem:[#allocation16 + $0x70] sm:$0xff] }
 0x1de   : > { %678 = vmatpush.msra.mxu0 %v635_v55  ;;  %697 = vmatpush.msra.mxu1 %v639_v57  ;;  %v838_v24 = vld [vmem:[#allocation17 + $0x140] sm:$0xff]  ;;  %v835_v28 = vld [vmem:[#allocation17 + $0x128] sm:$0xff]  ;;  %v832_v31 = vld [vmem:[#allocation17 + $0x110] sm:$0xff] }
 0x1df   : > { %856 = vmatpush.msra.mxu3 %v813_v56  ;;  %714 = vmatpush.msra.mxu2 %v649_v5  ;;  %v842_v25 = vld [vmem:[#allocation17 + $0x160] sm:$0xff]  ;;  %v839_v29 = vld [vmem:[#allocation17 + $0x148] sm:$0xff]  ;;  %v836_v34 = vld [vmem:[#allocation17 + $0x130] sm:$0xff] }
 0x1e0   : > { %679 = vmatpush.msra.mxu0 %v632_v59  ;;  %698 = vmatpush.msra.mxu1 %v636_v61  ;;  %v631_v35 = vld [vmem:[#allocation16 + $0x58] sm:$0xff]  ;;  %v628_v38 = vld [vmem:[#allocation16 + $0x40] sm:$0xff]  ;;  %v625_v42 = vld [vmem:[#allocation16 + $0x28] sm:$0xff] }
 0x1e1   : > { %857 = vmatpush.msra.mxu3 %v810_v60  ;;  %715 = vmatpush.msra.mxu2 %v646_v9  ;;  %v829_v36 = vld [vmem:[#allocation17 + $0xf8] sm:$0xff]  ;;  %v826_v40 = vld [vmem:[#allocation17 + $0xe0] sm:$0xff]  ;;  %v823_v43 = vld [vmem:[#allocation17 + $0xc8] sm:$0xff] }
 0x1e2   : > { %680 = vmatpush.msra.mxu0 %v629_v63  ;;  %699 = vmatpush.msra.mxu1 %v633_v4  ;;  %v833_v37 = vld [vmem:[#allocation17 + $0x118] sm:$0xff]  ;;  %v830_v41 = vld [vmem:[#allocation17 + $0x100] sm:$0xff]  ;;  %v827_v44 = vld [vmem:[#allocation17 + $0xe8] sm:$0xff] }
 0x1e3   : > { %858 = vmatpush.msra.mxu3 %v807_v0  ;;  %716 = vmatpush.msra.mxu2 %v643_v13  ;;  %v622_v45 = vld [vmem:[#allocation16 + $0x10] sm:$0xff]  ;;  %v817_v49 = vld [vmem:[#allocation17 + $0x98] sm:$0xff]  ;;  %v814_v51 = vld [vmem:[#allocation17 + $0x80] sm:$0xff] }
 0x1e4   : > { %681 = vmatpush.msra.mxu0 %v626_v6  ;;  %700 = vmatpush.msra.mxu1 %v630_v8  ;;  %v820_v46 = vld [vmem:[#allocation17 + $0xb0] sm:$0xff]  ;;  %v821_v50 = vld [vmem:[#allocation17 + $0xb8] sm:$0xff]  ;;  %v818_v52 = vld [vmem:[#allocation17 + $0xa0] sm:$0xff] }
 0x1e5   : > { %859 = vmatpush.msra.mxu3 %v804_v7  ;;  %717 = vmatpush.msra.mxu2 %v640_v23  ;;  %v824_v47 = vld [vmem:[#allocation17 + $0xd0] sm:$0xff]  ;;  %v811_v53 = vld [vmem:[#allocation17 + $0x68] sm:$0xff]  ;;  %v805_v57 = vld [vmem:[#allocation17 + $0x38] sm:$0xff] }
 0x1e6   : > { %682 = vmatpush.msra.mxu0 %v623_v10  ;;  %701 = vmatpush.msra.mxu1 %v627_v12  ;;  %v815_v54 = vld [vmem:[#allocation17 + $0x88] sm:$0xff]  ;;  %v808_v55 = vld [vmem:[#allocation17 + $0x50] sm:$0xff]  ;;  %v809_v58 = vld [vmem:[#allocation17 + $0x58] sm:$0xff] }
 0x1e7   : > { %860 = vmatpush.msra.mxu3 %v801_v11  ;;  %718 = vmatpush.msra.mxu2 %v637_v26  ;;  %v812_v56 = vld [vmem:[#allocation17 + $0x70] sm:$0xff]  ;;  %v802_v59 = vld [vmem:[#allocation17 + $0x20] sm:$0xff]  ;;  %v799_v61 = vld [vmem:[#allocation17 + $0x8] sm:$0xff] }
 0x1e8   : > { %683 = vmatpush.msra.mxu0 %v620_v14  ;;  %702 = vmatpush.msra.mxu1 %v624_v17  ;;  %v806_v60 = vld [vmem:[#allocation17 + $0x40] sm:$0xff]  ;;  %v803_v62 = vld [vmem:[#allocation17 + $0x28] sm:$0xff]  ;;  %v800_v63 = vld [vmem:[#allocation17 + $0x10] sm:$0xff] }
 0x1e9   : > { %861 = vmatpush.msra.mxu3 %v798_v15  ;;  %684 = vmatmul.f32.vlgmr.msra.gmra.mxu0 %v1888_v18  ;;  %v617_v0 = vld [vmem:[%s2195_s30] sm:$0xff]  ;;  %v618_v6 = vld [vmem:[%s2195_s30 + $0x8] sm:$0xff] }
 0x1ea   : > { %866 = vmatpush.msrb.mxu0 %v844_v16  ;;  %862 = vmatmul.f32.vlgmr.msra.gmra.mxu3 %v1884_v19  ;;  %v795_v9 = vld [vmem:[%s2199_s7] sm:$0xff] }
 0x1eb   : > { %703 = vmatpush.msra.mxu1 %v621_v21  ;;  %719 = vmatpush.msra.mxu2 %v634_v30 }
 0x1ec   : > { %867 = vmatpush.msrb.mxu0 %v841_v20  ;;  %704 = vmatmul.f32.vlgmr.msra.gmra.mxu1 %v1888_v18 }
 0x1ed   : > { %886 = vmatpush.msrb.mxu1 %v845_v22  ;;  %782 = vperm.xlu0 %1621, %v780_v33  }
 0x1ee   : > { %868 = vmatpush.msrb.mxu0 %v838_v24  ;;  %720 = vmatpush.msra.mxu2 %v631_v35 }
 0x1ef   : > { %887 = vmatpush.msrb.mxu1 %v842_v25 }
 0x1f0   : > { %869 = vmatpush.msrb.mxu0 %v835_v28  ;;  %721 = vmatpush.msra.mxu2 %v628_v38 }
 0x1f1   : > { %888 = vmatpush.msrb.mxu1 %v839_v29  ;;  %v768_v29 = vperm.slane %v2023_v2, 0 }
 0x1f2   : > { %870 = vmatpush.msrb.mxu0 %v832_v31  ;;  %722 = vmatpush.msra.mxu2 %v625_v42 }
 0x1f3   : > { %889 = vmatpush.msrb.mxu1 %v836_v34 }
 0x1f4   : > { %871 = vmatpush.msrb.mxu0 %v829_v36  ;;  %723 = vmatpush.msra.mxu2 %v622_v45 }
 0x1f5   : > { %890 = vmatpush.msrb.mxu1 %v833_v37  ;;  %724 = vmatmul.f32.vlgmr.msra.gmra.mxu2 %v1888_v18 }
 0x1f6   : > { %872 = vmatpush.msrb.mxu0 %v826_v40  ;;  %960 = vperm.xlu0 %1621, %v958_v48   ;;  %v796_v40 = vld [vmem:[%s2199_s7 + $0x8] sm:$0xff] }
 0x1f7   : > { %891 = vmatpush.msrb.mxu1 %v830_v41 }
 0x1f8   : > { %873 = vmatpush.msrb.mxu0 %v823_v43 }
 0x1f9   : > { %892 = vmatpush.msrb.mxu1 %v827_v44 }
 0x1fa   : > { %874 = vmatpush.msrb.mxu0 %v820_v46  ;;  %v619_v46 = vld [vmem:[%s2195_s30 + $0x10] sm:$0xff] }
 0x1fb   : > { %893 = vmatpush.msrb.mxu1 %v824_v47 }
 0x1fc   : > { %875 = vmatpush.msrb.mxu0 %v817_v49 }
 0x1fd   : > { %894 = vmatpush.msrb.mxu1 %v821_v50 }
 0x1fe   : > { %876 = vmatpush.msrb.mxu0 %v814_v51 }
 0x1ff   : > { %895 = vmatpush.msrb.mxu1 %v818_v52 }
 0x200   : > { %877 = vmatpush.msrb.mxu0 %v811_v53 }
 0x201   : > { %896 = vmatpush.msrb.mxu1 %v815_v54 }
 0x202   : > { %878 = vmatpush.msrb.mxu0 %v808_v55 }
 0x203   : > { %897 = vmatpush.msrb.mxu1 %v812_v56 }
 0x204   : > { %879 = vmatpush.msrb.mxu0 %v805_v57 }
 0x205   : > { %898 = vmatpush.msrb.mxu1 %v809_v58 }
 0x206   : > { %880 = vmatpush.msrb.mxu0 %v802_v59 }
 0x207   : > { %899 = vmatpush.msrb.mxu1 %v806_v60 }
 0x208   : > { %881 = vmatpush.msrb.mxu0 %v799_v61 }
 0x209   : > { %882 = vmatmul.f32.vlgmr.msrb.gmra.mxu0 %v1884_v19  ;;  %900 = vmatpush.msrb.mxu1 %v803_v62 }
 0x20b   : > { %901 = vmatpush.msrb.mxu1 %v800_v63  ;;  %v946_v63 = vperm.slane %v2028_v3, 0 }
 0x20c   : > { %902 = vmatmul.f32.vlgmr.msrb.gmra.mxu1 %v1884_v19 }
 0x266   : > { %v685_v4 = vpop.f32.mrf.mxu0 }
 0x267   : > { %v728_v5 = vadd.f32 %v685_v4, %v617_v0 }
 0x269   : > { %v1510_v7 = vmul.f32 -1.442695, %v728_v5  ;;  %v705_v8 = vpop.f32.mrf.mxu1 }
 0x26a   : > { %v748_v10 = vadd.f32 %v705_v8, %v618_v6  ;;  %v783_v6 = vpop.permute.xlu0 %782 }
 0x26b   : > { %1622 = vpow2.f32 %v1510_v7  ;;  %vm784_vm0 = vcmp.eq.s32.totalorder %v783_v6, 1 }
 0x26c   : > { %v1511_v12 = vmul.f32 -1.442695, %v748_v10 }
 0x26d   : > { %v863_v11 = vpop.f32.mrf.mxu3 }
 0x26e   : > { %v906_v13 = vadd.f32 %v863_v11, %v795_v9  ;;  %1624 = vpow2.f32 %v1511_v12 }
 0x270   : > { %v1515_v14 = vmul.f32 -1.442695, %v906_v13 }
 0x271   : > { %v1623_v15 = vpop.eup %1622 }
 0x272   : > { %1626 = vpow2.f32 %v1515_v14  ;;  %v732_v16 = vadd.f32 1.0, %v1623_v15 }
 0x274   : > { %v1625_v17 = vpop.eup %1624  ;;  %1628 = vrcp.f32 %v732_v16  ;;  %v742_v25 = vand.u32 2147483647, %v732_v16  ;;  %v744_v26 = vand.u32 2147483648, %v732_v16  ;;  %vm738_vm4 = vweird.f32 %v732_v16 }
 0x275   : > { %v752_v20 = vadd.f32 1.0, %v1625_v17 }
 0x276   : > { %vm743_vm7 = vcmp.eq.f32.partialorder %v742_v25, 8.507059e+37  ;;  %v745_v36 = vor.u32 1.1754944e-38, %v744_v26 }
 0x277   : > { %1630 = vrcp.f32 %v752_v20  ;;  %vm758_vm8 = vweird.f32 %v752_v20  ;;  %v764_v42 = vand.u32 2147483648, %v752_v20  ;;  %v762_v44 = vand.u32 2147483647, %v752_v20 }
 0x278   : > { %v1627_v21 = vpop.eup %1626  ;;  %v725_v31 = vpop.f32.mrf.mxu2 }
 0x279   : > { %v2202_v22 = vadd.f32 1.0, %v1627_v21  ;;  %v769_v38 = vadd.f32 %v768_v29, %v725_v31  ;;  %v765_v52 = vor.u32 1.1754944e-38, %v764_v42  ;;  %vm763_vm11 = vcmp.eq.f32.partialorder %v762_v44, 8.507059e+37 }
 0x27a   : > { %v1629_v23 = vpop.eup %1628 }
 0x27b   : > { %1632 = vrcp.f32 %v2202_v22  ;;  %v734_v24 = vmul.f32 %v1629_v23, %v732_v16  ;;  %vm739_vm5 = vweird.f32 %v1629_v23  ;;  %vm916_vm12 = vweird.f32 %v2202_v22 }
 0x27c   : > { %vm2206_vm6 = vmor %vm738_vm4, %vm739_vm5  ;;  %v922_v58 = vand.u32 2147483648, %v2202_v22  ;;  %v920_v60 = vand.u32 2147483647, %v2202_v22 }
 0x27d   : > { %v1631_v27 = vpop.eup %1630  ;;  %v735_v28 = vsub.f32 1.0, %v734_v24 }
 0x27e   : > { %v754_v30 = vmul.f32 %v1631_v27, %v752_v20  ;;  %vm759_vm9 = vweird.f32 %v1631_v27  ;;  %v923_v5 = vor.u32 1.1754944e-38, %v922_v58  ;;  %vm921_vm15 = vcmp.eq.f32.partialorder %v920_v60, 8.507059e+37  ;;  %v797_v20 = vld [vmem:[%s2199_s7 + $0x10] sm:$0xff] }
 0x27f   : > { %v736_v32 = vmul.f32 %v1629_v23, %v735_v28  ;;  %vm760_vm10 = vmor %vm758_vm8, %vm759_vm9 }
 0x280   : > { %v755_v34 = vsub.f32 1.0, %v754_v30 }
 0x281   : > { %v1633_v33 = vpop.eup %1632  ;;  %v737_v37 = vadd.f32 %v1629_v23, %v736_v32 }
 0x282   : > { %v912_v39 = vmul.f32 %v1633_v33, %v2202_v22  ;;  %v756_v41 = vmul.f32 %v1631_v27, %v755_v34  ;;  %vm917_vm13 = vweird.f32 %v1633_v33 }
 0x283   : > { %v741_v43 = vsel %vm2206_vm6, %v1629_v23, %v737_v37  ;;  %vm2219_vm14 = vmor %vm916_vm12, %vm917_vm13 }
 0x284   : > { %v746_v47 = vsel %vm743_vm7, %v745_v36, %v741_v43  ;;  %v913_v48 = vsub.f32 1.0, %v912_v39  ;;  %v757_v49 = vadd.f32 %v1631_v27, %v756_v41 }
 0x285   : > { %v770_v51 = vmul.f32 %v769_v38, %v746_v47 }
 0x286   : > { %v883_v45 = vpop.f32.mrf.mxu0  ;;  %v761_v55 = vsel %vm760_vm10, %v1631_v27, %v757_v49  ;;  %v914_v56 = vmul.f32 %v1633_v33, %v913_v48 }
 0x287   : > { %v926_v50 = vadd.f32 %v883_v45, %v796_v40  ;;  %v771_v54 = vadd.f32 %v770_v51, %v619_v46  ;;  %v766_v57 = vsel %vm763_vm11, %v765_v52, %v761_v55 }
 0x288   : > { %v915_v59 = vadd.f32 %v1633_v33, %v914_v56  ;;  %v773_v62 = vsub.f32 1.0, %v766_v57  ;;  %v775_v7 = vmul.f32 %v1888_v18, %v766_v57 }
 0x289   : > { %v1516_v53 = vmul.f32 -1.442695, %v926_v50  ;;  %v903_v4 = vpop.f32.mrf.mxu1 }
 0x28a   : > { %v919_v10 = vsel %vm2219_vm14, %v1633_v33, %v915_v59  ;;  %v947_v12 = vadd.f32 %v946_v63, %v903_v4  ;;  %v961_v33 = vpop.permute.xlu0 %960 }
 0x28b   : > { %1634 = vpow2.f32 %v1516_v53  ;;  %v924_v13 = vsel %vm921_vm15, %v923_v5, %v919_v10  ;;  %vm962_vm5 = vcmp.eq.s32.totalorder %v961_v33, 1 }
 0x28c   : > { %1636 = vtanh.f32 %v771_v54  ;;  %v948_v17 = vmul.f32 %v947_v12, %v924_v13 }
 0x28e   : > { %v949_v23 = vadd.f32 %v948_v17, %v797_v20 }
 0x291   : > { %v1635_v0 = vpop.eup %1634 }
 0x292   : > { %v1637_v8 = vpop.eup %1636  ;;  %v930_v9 = vadd.f32 1.0, %v1635_v0 }
 0x293   : > { %v774_v11 = vmul.f32 %v1637_v8, %v773_v62 }
 0x294   : > { %1638 = vrcp.f32 %v930_v9  ;;  %v942_v25 = vand.u32 2147483648, %v930_v9  ;;  %v940_v27 = vand.u32 2147483647, %v930_v9  ;;  %vm936_vm2 = vweird.f32 %v930_v9 }
 0x295   : > { %v776_v14 = vadd.f32 %v775_v7, %v774_v11  ;;  %1640 = vtanh.f32 %v949_v23 }
 0x296   : > { %v943_v29 = vor.u32 1.1754944e-38, %v942_v25  ;;  %vm941_vm4 = vcmp.eq.f32.partialorder %v940_v27, 8.507059e+37 }
 0x297   : > { %v785_v15 = vsel %vm784_vm0, %v776_v14, 0.0  ;;  %v789_v16 = vsel %vm784_vm0, %v776_v14, %v1888_v18  }
 0x298   : > { %788 = vst [vmem:[%s787_s14] sm:$0xff] %v785_v15 }
 0x29a   : > { %v1639_v21 = vpop.eup %1638 }
 0x29b   : > { %v932_v22 = vmul.f32 %v1639_v21, %v930_v9  ;;  %vm937_vm1 = vweird.f32 %v1639_v21  ;;  %v1641_v32 = vpop.eup %1640 }
 0x29c   : > { %vm938_vm3 = vmor %vm936_vm2, %vm937_vm1 }
 0x29d   : > { %v933_v24 = vsub.f32 1.0, %v932_v22 }
 0x29f   : > { %v934_v26 = vmul.f32 %v1639_v21, %v933_v24 }
 0x2a1   : > { %v935_v28 = vadd.f32 %v1639_v21, %v934_v26 }
 0x2a3   : > { %v939_v30 = vsel %vm938_vm3, %v1639_v21, %v935_v28  ;;  %v2280_v21 = vmov (%p608_p8), %v789_v16 }
 0x2a4   : > { %v944_v18 = vsel %vm941_vm4, %v943_v29, %v939_v30 }
 0x2a5   : > { %v951_v31 = vsub.f32 1.0, %v944_v18  ;;  %v953_v35 = vmul.f32 %v1884_v19, %v944_v18  ;;  %v2278_v18 = vmov %v789_v16 }
 0x2a7   : > { %v952_v34 = vmul.f32 %v1641_v32, %v951_v31 }
 0x2a8   :  { %611 = sbr.rel (!%p608_p8) target bundleno = 457 (0x1c9), region = 178 }
 0x2a9   : > { %v954_v36 = vadd.f32 %v953_v35, %v952_v34 }
 0x2ab   : > { %v963_v37 = vsel %vm962_vm5, %v954_v36, 0.0  ;;  %v967_v38 = vsel %vm962_vm5, %v954_v36, %v1884_v19  }
 0x2ac   : > { %966 = vst [vmem:[%s965_s13] sm:$0xff] %v963_v37  ;;  %v2277_v19 = vmov %v967_v38  ;;  %v2279_v20 = vmov (%p608_p8), %v967_v38 }
 0x2ad PF:  { %1336 = vst [vmem:[#allocation4] sm:$0xff] %v1900_v21  ;;  %s1344_s17 = sshll.u32 %s2269_s10, 4  ;;  %s1918_s18 = smov [#allocation19]   ;;  %v1900_v21 = vphi %v2272_v21, %v2280_v21   ;;  %v1896_v20 = vphi %v2271_v20, %v2279_v20   ;;  %s1345_s17 = int_to_ptr.hbm [resolvable:$true] %s1344_s17 }
 0x2ae   :  { %1337 = vst [vmem:[#allocation5] sm:$0xff] %v1896_v20  ;;  %s1342_s5 = sshll.u32 %s1918_s18, 4  ;;  %s1919_s0 = smov [#allocation20]   ;;  %s1343_s5 = int_to_ptr.vmem [resolvable:$true] %s1342_s5 }
 0x2af   :  { %1350 = dma.vmem_to_hbm [thread:$0]  %s1343_s5, 1024, %s1345_s17, [#allocation10], %s1903_s22, %s1903_s22, %s1904_s23  }
 0x2b0   :  { %s1359_s3 = sshll.u32 %s1919_s0, 4  ;;  %s1361_s1 = sshll.u32 %s2270_s11, 4  ;;  %s1360_s3 = int_to_ptr.vmem [resolvable:$true] %s1359_s3  ;;  %s1362_s1 = int_to_ptr.hbm [resolvable:$true] %s1361_s1 }
 0x2b1   :  { %1367 = dma.vmem_to_hbm [thread:$0]  %s1360_s3, 1024, %s1362_s1, [#allocation21], %s1903_s22, %s1903_s22, %s1904_s23  }
 0x2b2   :  { %1870 = dma.done.wait [#allocation10], 1024  }
 0x2b3   :  { %1871 = vsyncadd [#allocation10], 4294966272 }
 0x2b4   :  { %1872 = dma.done.wait [#allocation21], 1024  }
 0x2b5   :  { %1873 = vsyncadd [#allocation21], 4294966272 }
 0x2b6   :  { %1376 = vsyncpa [#allocation9], 1 }
 0x2b7   :  { %1377 = vsyncpa [#allocation12], 1 }
 0x2b8   :  { %1378 = vsyncpa [#allocation15], 1 }
 0x2b9   :  { %1379 = vsyncpa [#allocation18], 1 }
 0x2ba   :  { %1380 = vsyncpa [#allocation10], 1 }
 0x2bb   :  { %1381 = vsyncpa [#allocation21], 1 }

</bundles_post_ra>
